<compile_context>
chip_gen: v6e
topology: v6e:2x2x1
jax: 0.10.0
libtpu: 0.0.40
codegen_flags: <defaults>
</compile_context>

<pallas_src>
import functools

import numpy as np
import jax
import jax.numpy as jnp
from jax.experimental import pallas as pl
from jax.experimental.pallas import tpu as pltpu

K_SIZE, STRIDE, PAD = 8, 4, 2  # UpBlock defaults (hard-coded in the phase math)


# --------------------------- parameter preprocessing -------------------------
# Done ONCE, outside the jitted forward path.

def _deconv_phase_weight(w_t):
    """ConvTranspose2d weight (Cin, Cout, K, K) -> (9*Cin, 16*Cout) phase GEMM
    weight.  Output (4*qy+ry, 4*qx+rx) is produced from the 3x3 zero-padded
    input neighbourhood of (qy, qx); tap ky = ry + PAD - STRIDE*dy if valid."""
    Cin, Cout = w_t.shape[0], w_t.shape[1]
    w_np = np.asarray(w_t, np.float32)
    Wb = np.zeros((3, 3, Cin, STRIDE, STRIDE, Cout), np.float32)
    for dy in (-1, 0, 1):
        for ry in range(STRIDE):
            ky = ry + PAD - STRIDE * dy
            if not 0 <= ky < K_SIZE:
                continue
            for dx in (-1, 0, 1):
                for rx in range(STRIDE):
                    kx = rx + PAD - STRIDE * dx
                    if not 0 <= kx < K_SIZE:
                        continue
                    Wb[dy + 1, dx + 1, :, ry, rx, :] = w_np[:, :, ky, kx]
    return Wb.reshape(9 * Cin, STRIDE * STRIDE * Cout)


def _conv_phase_weight(w_t):
    """Conv2d weight (Cout, Cin, K, K) [k=8, s=4, p=2] -> (3, 3, 16*Cin, Cout)
    weight that reads the deconv output DIRECTLY in its (ry, rx, c) phase
    layout: l0(q) = sum_{dy,dx} h0_phase[q + (dy,dx)] @ W[dy,dx].  The kernel
    tap is ky = STRIDE*dy + ry + PAD (zero-filled where out of range)."""
    Cout, Cin = w_t.shape[0], w_t.shape[1]
    w_np = np.asarray(w_t, np.float32)
    Wb = np.zeros((3, 3, STRIDE, STRIDE, Cin, Cout), np.float32)
    for dy in (-1, 0, 1):
        for ry in range(STRIDE):
            ky = STRIDE * dy + ry + PAD
            if not 0 <= ky < K_SIZE:
                continue
            for dx in (-1, 0, 1):
                for rx in range(STRIDE):
                    kx = STRIDE * dx + rx + PAD
                    if not 0 <= kx < K_SIZE:
                        continue
                    Wb[dy + 1, dx + 1, ry, rx, :, :] = w_np[:, :, ky, kx].T
    return Wb.reshape(3, 3, STRIDE * STRIDE * Cin, Cout)


def prepare_params(params):
    C = params['w1'].shape[0]
    S2 = STRIDE * STRIDE
    # Guard: single-scalar PReLU (PyTorch default num_parameters=1).
    for k in ('a1', 'a2', 'a3'):
        assert params[k].shape == (1,), "per-channel PReLU not supported here"
    return {
        'alpha': jnp.concatenate(
            [params['a1'], params['a2'], params['a3']]).astype(jnp.float32),
        'w1': jnp.asarray(_deconv_phase_weight(params['w1']), jnp.bfloat16),
        'b1': jnp.tile(params['b1'], S2).reshape(1, S2 * C).astype(jnp.float32),
        'w2': jnp.asarray(_conv_phase_weight(params['w2']), jnp.bfloat16),
        'b2': params['b2'].reshape(1, C).astype(jnp.float32),
        'w3': jnp.asarray(_deconv_phase_weight(params['w3']), jnp.bfloat16),
        'b3': jnp.tile(params['b3'], S2).reshape(1, S2 * C).astype(jnp.float32),
    }


# ------------------------------- fused kernel --------------------------------

def _upblock_kernel(alpha_ref, x_ref, w1_ref, b1_ref, w2_ref, b2_ref,
                    w3_ref, b3_ref, o_ref, *, H, W, C, th):
    """Whole UpBlock for one (batch, row-block): deconv1 -> conv2 -> deconv3
    with both residuals, entirely in VMEM (no HBM patch slabs / transposes)."""
    P = 16 * C                        # phase-channel width, columns = (ry,rx,c)
    re, rm = th + 4, th + 2           # h0 / l0 extended row counts (halo)
    i = pl.program_id(1)
    r0 = pl.multiple_of(i * th, th)   # first output (qy) row of this block

    a1, a2, a3 = alpha_ref[0], alpha_ref[1], alpha_ref[2]

    def prelu(v, a):
        return jnp.where(v >= 0.0, v, a * v)

    # x window: original x rows [r0-3, r0+th+3), cols [-1, W+1) (zero-padded).
    xw = x_ref[0, pl.ds(r0, th + 6), :, :]                 # (th+6, W+2, C) f32
    xw_bf = xw.astype(jnp.bfloat16)

    # ---- up_conv1: ConvTranspose2d(k8,s4,p2) + PReLU (stride-phase GEMM) ----
    # 3x3 neighbourhood of every (qy, qx) -> one 9C GEMM row -> all 16 phases.
    p1 = jnp.concatenate(
        [xw_bf[dy:dy + re, dx:dx + W, :]
         for dy in range(3) for dx in range(3)], axis=-1).reshape(re * W, 9 * C)
    h0 = jnp.dot(p1, w1_ref[...], preferred_element_type=jnp.float32)
    h0 = prelu(h0 + b1_ref[...], a1).reshape(re, W, P)
    # Rows whose qy falls outside the image act as conv2's zero-padding ring.
    qy = jax.lax.broadcasted_iota(jnp.int32, (re, 1, 1), 0) + (r0 - 2)
    h0 = jnp.where(jnp.logical_and(qy >= 0, qy < H), h0, 0.0)

    # ---- up_conv2: Conv2d(k8,s4,p2) + PReLU, read directly in phase layout --
    zc = jnp.zeros((re, 1, P), jnp.bfloat16)
    h0c = jnp.concatenate([zc, h0.astype(jnp.bfloat16), zc], axis=1)
    w2 = w2_ref[...]                                       # (3, 3, P, C) bf16
    acc = jnp.zeros((rm * W, C), jnp.float32)
    for dy in range(3):
        for dx in range(3):
            lhs = h0c[dy:dy + rm, dx:dx + W, :].reshape(rm * W, P)
            acc = acc + jnp.dot(lhs, w2[dy, dx],
                                preferred_element_type=jnp.float32)
    l0 = prelu(acc + b2_ref[...], a2)
    # fused residual: d = l0 - x   (x rows [r0-1, r0+th+1), f32)
    d = (l0 - xw[2:2 + rm, 1:1 + W, :].reshape(rm * W, C)).reshape(rm, W, C)
    oy = jax.lax.broadcasted_iota(jnp.int32, (rm, 1, 1), 0) + (r0 - 1)
    d = jnp.where(jnp.logical_and(oy >= 0, oy < H), d, 0.0).astype(jnp.bfloat16)

    # ---- up_conv3: ConvTranspose2d(k8,s4,p2) + PReLU, fused "+ h0" ----------
    zd = jnp.zeros((rm, 1, C), jnp.bfloat16)
    dc = jnp.concatenate([zd, d, zd], axis=1)              # (rm, W+2, C)
    p3 = jnp.concatenate(
        [dc[dy:dy + th, dx:dx + W, :]
         for dy in range(3) for dx in range(3)], axis=-1).reshape(th * W, 9 * C)
    h1 = jnp.dot(p3, w3_ref[...], preferred_element_type=jnp.float32)
    h1 = prelu(h1 + b3_ref[...], a3)
    out = h1 + h0[2:2 + th, :, :].reshape(th * W, P)       # residual "+ h0"
    o_ref[0] = out.reshape(th, W, P)                       # lane-dense (16*C)


# ------------------------- VMEM-aware block-row picker -----------------------

def _vmem_estimate_bytes(th, H, W, C):
    """Rough full-footprint estimate for one grid step (with 1.5x slack)."""
    P = 16 * C
    re, rm = th + 4, th + 2
    weights = 2 * 2 * (2 * 9 * C * P + 9 * P * C)            # w1,w3,w2 bf16, x2 buf
    io = 2 * 4 * ((H + 6) * (W + 2) * C + th * W * P)        # x + out blocks, x2 buf
    interm = (re * W * (9 * C * 2 + P * 4)                   # p1 (bf16) + h0 (f32)
              + re * (W + 2) * P * 2                         # h0c (bf16)
              + rm * W * (P * 2 + 3 * C * 4)                 # conv2 lhs + acc/l0/d
              + th * W * (9 * C * 2 + 2 * P * 4))            # p3 + h1/out
    return int(1.5 * (weights + io + interm))


def _pick_block_rows(H, W, C, vmem_cap):
    budget = int(0.4 * vmem_cap)
    best = 1
    for th in range(1, H + 1):
        if H % th == 0 and (th == 1 or _vmem_estimate_bytes(th, H, W, C) <= budget):
            best = th
    return best


# ------------------------------ UpBlock forward ------------------------------

def upblock_pallas(x_nchw, prep, block_rows=None):
    """UpBlock forward: x (N, C, H, W) f32 -> (N, C, 4H, 4W) f32."""
    x = jnp.transpose(x_nchw, (0, 2, 3, 1)).astype(jnp.float32)   # NHWC
    N, H, W, C = x.shape
    P = 16 * C

    try:
        vmem_cap = int(pltpu.get_tpu_info().vmem_capacity_bytes)
    except Exception:
        vmem_cap = 64 << 20                                       # conservative
    th = block_rows if block_rows is not None else _pick_block_rows(H, W, C, vmem_cap)
    assert H % th == 0, "block_rows must divide H"
    est = _vmem_estimate_bytes(th, H, W, C)
    vmem_limit = int(min(max(32 << 20, 2 * est), int(0.85 * vmem_cap)))

    # One cheap zero-pad of x in HBM (halo source); everything else is in VMEM.
    xp = jnp.pad(x, ((0, 0), (3, 3), (1, 1), (0, 0)))

    n_blk = H // th
    flops = 2 * N * n_blk * W * ((th + 4) * 9 * C * P
                                 + (th + 2) * 9 * P * C
                                 + th * 9 * C * P)
    bytes_accessed = (xp.size * 4 + N * H * W * P * 4
                      + N * (2 * 9 * C * P + 9 * P * C) * 2)
    cost = pl.CostEstimate(flops=flops, transcendentals=0,
                           bytes_accessed=bytes_accessed)

    kernel = functools.partial(_upblock_kernel, H=H, W=W, C=C, th=th)
    out_phase = pl.pallas_call(
        kernel,
        out_shape=jax.ShapeDtypeStruct((N, H, W, P), jnp.float32),
        grid=(N, n_blk),
        in_specs=[
            pl.BlockSpec(memory_space=pltpu.MemorySpace.SMEM),              # alphas
            pl.BlockSpec((1, H + 6, W + 2, C), lambda n, i: (n, 0, 0, 0)),  # x (resident per n)
            pl.BlockSpec((9 * C, P), lambda n, i: (0, 0)),                  # w1 bf16
            pl.BlockSpec((1, P), lambda n, i: (0, 0)),                      # b1
            pl.BlockSpec((3, 3, P, C), lambda n, i: (0, 0, 0, 0)),          # w2 bf16
            pl.BlockSpec((1, C), lambda n, i: (0, 0)),                      # b2
            pl.BlockSpec((9 * C, P), lambda n, i: (0, 0)),                  # w3 bf16
            pl.BlockSpec((1, P), lambda n, i: (0, 0)),                      # b3
        ],
        out_specs=pl.BlockSpec((1, th, W, P), lambda n, i: (n, i, 0, 0)),
        compiler_params=pltpu.CompilerParams(
            dimension_semantics=("parallel", "parallel"),
            vmem_limit_bytes=vmem_limit),
        cost_estimate=cost,
    )(prep['alpha'], xp, prep['w1'], prep['b1'], prep['w2'], prep['b2'],
      prep['w3'], prep['b3'])

    # Single layout fixup at the module boundary: phase layout -> NCHW.
    y = out_phase.reshape(N, H, W, STRIDE, STRIDE, C)
    return jnp.transpose(y, (0, 5, 1, 3, 2, 4)).reshape(
        N, C, STRIDE * H, STRIDE * W)


# ----------------------------- pure-JAX reference ----------------------------

def upblock_reference(x, params):
    K, S, Pd = K_SIZE, STRIDE, PAD
    dn = ('NCHW', 'OIHW', 'NCHW')
    hp = jax.lax.Precision.HIGHEST

    def prelu(v, a):
        return jnp.where(v >= 0, v, a * v)

    def deconv(v, w, b, a):
        w_oihw = jnp.flip(w, axis=(2, 3)).transpose(1, 0, 2, 3)
        out = jax.lax.conv_general_dilated(
            v, w_oihw, window_strides=(1, 1),
            padding=[(K - 1 - Pd, K - 1 - Pd)] * 2, lhs_dilation=(S, S),
            dimension_numbers=dn, precision=hp)
        return prelu(out + b.reshape(1, -1, 1, 1), a[0])

    def conv(v, w, b, a):
        out = jax.lax.conv_general_dilated(
            v, w, window_strides=(S, S), padding=[(Pd, Pd)] * 2,
            dimension_numbers=dn, precision=hp)
        return prelu(out + b.reshape(1, -1, 1, 1), a[0])

    h0 = deconv(x, params['w1'], params['b1'], params['a1'])
    l0 = conv(h0, params['w2'], params['b2'], params['a2'])
    h1 = deconv(l0 - x, params['w3'], params['b3'], params['a3'])
    return h1 + h0


# ------------------------------------ main -----------------------------------

if __name__ == "__main__":
    C = 8                  # num_filter
    N, H, W = 2, 8, 8
    K = K_SIZE

    key = jax.random.PRNGKey(0)
    ks = jax.random.split(key, 8)
    params = {
        # ConvTranspose2d weight layout: (in, out, kH, kW)
        'w1': 0.1 * jax.random.normal(ks[0], (C, C, K, K), jnp.float32),
        'b1': 0.1 * jax.random.normal(ks[1], (C,), jnp.float32),
        'a1': jnp.array([0.25], jnp.float32),       # PReLU default init
        # Conv2d weight layout: (out, in, kH, kW)
        'w2': 0.1 * jax.random.normal(ks[2], (C, C, K, K), jnp.float32),
        'b2': 0.1 * jax.random.normal(ks[3], (C,), jnp.float32),
        'a2': jnp.array([0.25], jnp.float32),
        'w3': 0.1 * jax.random.normal(ks[4], (C, C, K, K), jnp.float32),
        'b3': 0.1 * jax.random.normal(ks[5], (C,), jnp.float32),
        'a3': jnp.array([0.25], jnp.float32),
    }
    x = jax.random.normal(ks[6], (N, C, H, W), jnp.float32)   # NCHW input

    prep = prepare_params(params)                 # hoisted weight preprocessing
    # block_rows=4 -> 2 row blocks per image: exercises the halo / mask path.
    fwd = jax.jit(functools.partial(upblock_pallas, block_rows=4))

    out = jax.block_until_ready(fwd(x, prep))
    assert out.shape == (N, C, H * STRIDE, W * STRIDE)

    ref = upblock_reference(x, params)
    np.testing.assert_allclose(np.asarray(out), np.asarray(ref),
                               rtol=5e-2, atol=5e-2)

    print("KERNEL_OK")
</pallas_src>

<mosaic_0001>
module attributes {stable_mosaic.version = 11 : i64} {
  func.func @_upblock_kernel(%arg0: i32, %arg1: i32, %arg2: memref<3xf32, #tpu.memory_space<smem>>, %arg3: memref<1x14x10x8xf32, #tpu.memory_space<vmem>>, %arg4: memref<72x128xbf16, #tpu.memory_space<vmem>>, %arg5: memref<1x128xf32, #tpu.memory_space<vmem>>, %arg6: memref<3x3x128x8xbf16, #tpu.memory_space<vmem>>, %arg7: memref<1x8xf32, #tpu.memory_space<vmem>>, %arg8: memref<72x128xbf16, #tpu.memory_space<vmem>>, %arg9: memref<1x128xf32, #tpu.memory_space<vmem>>, %arg10: memref<1x4x8x128xf32, #tpu.memory_space<vmem>>) attributes {dimension_semantics = [#tpu.dimension_semantics<parallel>, #tpu.dimension_semantics<parallel>], iteration_bounds = array<i64: 2, 2>, scalar_prefetch = 0 : i64, scratch_operands = 0 : i64, tpu.core_type = #tpu.core_type<tc>, window_params = [{transform_indices = @transform_0, window_bounds = array<i64: 3>}, {transform_indices = @transform_1, window_bounds = array<i64: 1, 14, 10, 8>}, {pipeline_mode = #tpu.pipeline_mode<synchronous>, transform_indices = @transform_2, window_bounds = array<i64: 72, 128>}, {pipeline_mode = #tpu.pipeline_mode<synchronous>, transform_indices = @transform_3, window_bounds = array<i64: 1, 128>}, {pipeline_mode = #tpu.pipeline_mode<synchronous>, transform_indices = @transform_4, window_bounds = array<i64: 3, 3, 128, 8>}, {pipeline_mode = #tpu.pipeline_mode<synchronous>, transform_indices = @transform_5, window_bounds = array<i64: 1, 8>}, {pipeline_mode = #tpu.pipeline_mode<synchronous>, transform_indices = @transform_6, window_bounds = array<i64: 72, 128>}, {pipeline_mode = #tpu.pipeline_mode<synchronous>, transform_indices = @transform_7, window_bounds = array<i64: 1, 128>}, {transform_indices = @transform_8, window_bounds = array<i64: 1, 4, 8, 128>}]} {
    %c4_i32 = arith.constant 4 : i32
    %0 = arith.muli %arg1, %c4_i32 : i32
    %1 = tpu.assume_multiple %0, 4 : i32
    %c0 = arith.constant 0 : index
    %2 = memref.load %arg2[%c0] : memref<3xf32, #tpu.memory_space<smem>>
    %c1 = arith.constant 1 : index
    %3 = memref.load %arg2[%c1] : memref<3xf32, #tpu.memory_space<smem>>
    %c2 = arith.constant 2 : index
    %4 = memref.load %arg2[%c2] : memref<3xf32, #tpu.memory_space<smem>>
    %c0_0 = arith.constant 0 : index
    %5 = arith.index_cast %1 : i32 to index
    %c0_1 = arith.constant 0 : index
    %c0_2 = arith.constant 0 : index
    %6 = vector.load %arg3[%c0_0, %5, %c0_1, %c0_2] : memref<1x14x10x8xf32, #tpu.memory_space<vmem>>, vector<1x10x10x8xf32>
    %7 = vector.shape_cast %6 : vector<1x10x10x8xf32> to vector<10x10x8xf32>
    %8 = arith.truncf %7 : vector<10x10x8xf32> to vector<10x10x8xbf16>
    %9 = vector.extract_strided_slice %8 {offsets = [0, 0, 0], sizes = [8, 8, 8], strides = [1, 1, 1]} : vector<10x10x8xbf16> to vector<8x8x8xbf16>
    %10 = vector.extract_strided_slice %8 {offsets = [0, 1, 0], sizes = [8, 8, 8], strides = [1, 1, 1]} : vector<10x10x8xbf16> to vector<8x8x8xbf16>
    %11 = vector.extract_strided_slice %8 {offsets = [0, 2, 0], sizes = [8, 8, 8], strides = [1, 1, 1]} : vector<10x10x8xbf16> to vector<8x8x8xbf16>
    %12 = vector.extract_strided_slice %8 {offsets = [1, 0, 0], sizes = [8, 8, 8], strides = [1, 1, 1]} : vector<10x10x8xbf16> to vector<8x8x8xbf16>
    %13 = vector.extract_strided_slice %8 {offsets = [1, 1, 0], sizes = [8, 8, 8], strides = [1, 1, 1]} : vector<10x10x8xbf16> to vector<8x8x8xbf16>
    %14 = vector.extract_strided_slice %8 {offsets = [1, 2, 0], sizes = [8, 8, 8], strides = [1, 1, 1]} : vector<10x10x8xbf16> to vector<8x8x8xbf16>
    %15 = vector.extract_strided_slice %8 {offsets = [2, 0, 0], sizes = [8, 8, 8], strides = [1, 1, 1]} : vector<10x10x8xbf16> to vector<8x8x8xbf16>
    %16 = vector.extract_strided_slice %8 {offsets = [2, 1, 0], sizes = [8, 8, 8], strides = [1, 1, 1]} : vector<10x10x8xbf16> to vector<8x8x8xbf16>
    %17 = vector.extract_strided_slice %8 {offsets = [2, 2, 0], sizes = [8, 8, 8], strides = [1, 1, 1]} : vector<10x10x8xbf16> to vector<8x8x8xbf16>
    %18 = tpu.concatenate %9, %10, %11, %12, %13, %14, %15, %16, %17 in 2 : vector<8x8x8xbf16>, vector<8x8x8xbf16>, vector<8x8x8xbf16>, vector<8x8x8xbf16>, vector<8x8x8xbf16>, vector<8x8x8xbf16>, vector<8x8x8xbf16>, vector<8x8x8xbf16>, vector<8x8x8xbf16> -> vector<8x8x72xbf16>
    %19 = vector.shape_cast %18 : vector<8x8x72xbf16> to vector<64x72xbf16>
    %c0_3 = arith.constant 0 : index
    %c0_4 = arith.constant 0 : index
    %20 = vector.load %arg4[%c0_3, %c0_4] : memref<72x128xbf16, #tpu.memory_space<vmem>>, vector<72x128xbf16>
    %cst = arith.constant dense<0.000000e+00> : vector<64x128xf32>
    %21 = tpu.matmul %19, %20, %cst {dimension_numbers = #tpu.dot_dimension_numbers<[1], [0], [0], [1], [0, 0, 1, 1], [], []>} : vector<64x72xbf16>, vector<72x128xbf16>, vector<64x128xf32> -> vector<64x128xf32>
    %c0_5 = arith.constant 0 : index
    %c0_6 = arith.constant 0 : index
    %22 = vector.load %arg5[%c0_5, %c0_6] : memref<1x128xf32, #tpu.memory_space<vmem>>, vector<1x128xf32>
    %23 = vector.broadcast %22 : vector<1x128xf32> to vector<64x128xf32>
    %24 = arith.addf %21, %23 : vector<64x128xf32>
    %cst_7 = arith.constant 0.000000e+00 : f32
    %25 = vector.broadcast %cst_7 : f32 to vector<64x128xf32>
    %26 = arith.cmpf oge, %24, %25 : vector<64x128xf32>
    %27 = vector.broadcast %2 : f32 to vector<64x128xf32>
    %28 = arith.mulf %27, %24 : vector<64x128xf32>
    %29 = arith.select %26, %24, %28 : vector<64x128xi1>, vector<64x128xf32>
    %30 = vector.shape_cast %29 : vector<64x128xf32> to vector<8x8x128xf32>
    %31 = tpu.iota {dimensions = array<i32: 0>} : vector<8x1x1xi32>
    %c2_i32 = arith.constant 2 : i32
    %32 = arith.subi %1, %c2_i32 : i32
    %33 = vector.broadcast %32 : i32 to vector<8x1x1xi32>
    %34 = arith.addi %31, %33 : vector<8x1x1xi32>
    %c0_i32 = arith.constant 0 : i32
    %35 = vector.broadcast %c0_i32 : i32 to vector<8x1x1xi32>
    %36 = arith.cmpi sge, %34, %35 : vector<8x1x1xi32>
    %c8_i32 = arith.constant 8 : i32
    %37 = vector.broadcast %c8_i32 : i32 to vector<8x1x1xi32>
    %38 = arith.cmpi slt, %34, %37 : vector<8x1x1xi32>
    %39 = arith.andi %36, %38 : vector<8x1x1xi1>
    %cst_8 = arith.constant 0.000000e+00 : f32
    %40 = vector.shape_cast %39 : vector<8x1x1xi1> to vector<8x1x1xi1>
    %41 = vector.broadcast %40 : vector<8x1x1xi1> to vector<8x8x128xi1>
    %42 = vector.broadcast %cst_8 : f32 to vector<8x8x128xf32>
    %43 = arith.select %41, %30, %42 : vector<8x8x128xi1>, vector<8x8x128xf32>
    %cst_9 = arith.constant 0.000000e+00 : bf16
    %44 = vector.broadcast %cst_9 : bf16 to vector<8x1x128xbf16>
    %45 = arith.truncf %43 : vector<8x8x128xf32> to vector<8x8x128xbf16>
    %46 = tpu.concatenate %44, %45, %44 in 1 : vector<8x1x128xbf16>, vector<8x8x128xbf16>, vector<8x1x128xbf16> -> vector<8x10x128xbf16>
    %c0_10 = arith.constant 0 : index
    %c0_11 = arith.constant 0 : index
    %c0_12 = arith.constant 0 : index
    %c0_13 = arith.constant 0 : index
    %47 = vector.load %arg6[%c0_10, %c0_11, %c0_12, %c0_13] : memref<3x3x128x8xbf16, #tpu.memory_space<vmem>>, vector<3x3x128x8xbf16>
    %cst_14 = arith.constant 0.000000e+00 : f32
    %48 = vector.broadcast %cst_14 : f32 to vector<48x8xf32>
    %49 = vector.extract_strided_slice %46 {offsets = [0, 0, 0], sizes = [6, 8, 128], strides = [1, 1, 1]} : vector<8x10x128xbf16> to vector<6x8x128xbf16>
    %50 = vector.shape_cast %49 : vector<6x8x128xbf16> to vector<48x128xbf16>
    %51 = vector.extract_strided_slice %47 {offsets = [0, 0, 0, 0], sizes = [1, 1, 128, 8], strides = [1, 1, 1, 1]} : vector<3x3x128x8xbf16> to vector<1x1x128x8xbf16>
    %52 = vector.shape_cast %51 : vector<1x1x128x8xbf16> to vector<128x8xbf16>
    %cst_15 = arith.constant dense<0.000000e+00> : vector<48x8xf32>
    %53 = tpu.matmul %50, %52, %cst_15 {dimension_numbers = #tpu.dot_dimension_numbers<[1], [0], [0], [1], [0, 0, 1, 1], [], []>} : vector<48x128xbf16>, vector<128x8xbf16>, vector<48x8xf32> -> vector<48x8xf32>
    %54 = arith.addf %48, %53 : vector<48x8xf32>
    %55 = vector.extract_strided_slice %46 {offsets = [0, 1, 0], sizes = [6, 8, 128], strides = [1, 1, 1]} : vector<8x10x128xbf16> to vector<6x8x128xbf16>
    %56 = vector.shape_cast %55 : vector<6x8x128xbf16> to vector<48x128xbf16>
    %57 = vector.extract_strided_slice %47 {offsets = [0, 1, 0, 0], sizes = [1, 1, 128, 8], strides = [1, 1, 1, 1]} : vector<3x3x128x8xbf16> to vector<1x1x128x8xbf16>
    %58 = vector.shape_cast %57 : vector<1x1x128x8xbf16> to vector<128x8xbf16>
    %cst_16 = arith.constant dense<0.000000e+00> : vector<48x8xf32>
    %59 = tpu.matmul %56, %58, %cst_16 {dimension_numbers = #tpu.dot_dimension_numbers<[1], [0], [0], [1], [0, 0, 1, 1], [], []>} : vector<48x128xbf16>, vector<128x8xbf16>, vector<48x8xf32> -> vector<48x8xf32>
    %60 = arith.addf %54, %59 : vector<48x8xf32>
    %61 = vector.extract_strided_slice %46 {offsets = [0, 2, 0], sizes = [6, 8, 128], strides = [1, 1, 1]} : vector<8x10x128xbf16> to vector<6x8x128xbf16>
    %62 = vector.shape_cast %61 : vector<6x8x128xbf16> to vector<48x128xbf16>
    %63 = vector.extract_strided_slice %47 {offsets = [0, 2, 0, 0], sizes = [1, 1, 128, 8], strides = [1, 1, 1, 1]} : vector<3x3x128x8xbf16> to vector<1x1x128x8xbf16>
    %64 = vector.shape_cast %63 : vector<1x1x128x8xbf16> to vector<128x8xbf16>
    %cst_17 = arith.constant dense<0.000000e+00> : vector<48x8xf32>
    %65 = tpu.matmul %62, %64, %cst_17 {dimension_numbers = #tpu.dot_dimension_numbers<[1], [0], [0], [1], [0, 0, 1, 1], [], []>} : vector<48x128xbf16>, vector<128x8xbf16>, vector<48x8xf32> -> vector<48x8xf32>
    %66 = arith.addf %60, %65 : vector<48x8xf32>
    %67 = vector.extract_strided_slice %46 {offsets = [1, 0, 0], sizes = [6, 8, 128], strides = [1, 1, 1]} : vector<8x10x128xbf16> to vector<6x8x128xbf16>
    %68 = vector.shape_cast %67 : vector<6x8x128xbf16> to vector<48x128xbf16>
    %69 = vector.extract_strided_slice %47 {offsets = [1, 0, 0, 0], sizes = [1, 1, 128, 8], strides = [1, 1, 1, 1]} : vector<3x3x128x8xbf16> to vector<1x1x128x8xbf16>
    %70 = vector.shape_cast %69 : vector<1x1x128x8xbf16> to vector<128x8xbf16>
    %cst_18 = arith.constant dense<0.000000e+00> : vector<48x8xf32>
    %71 = tpu.matmul %68, %70, %cst_18 {dimension_numbers = #tpu.dot_dimension_numbers<[1], [0], [0], [1], [0, 0, 1, 1], [], []>} : vector<48x128xbf16>, vector<128x8xbf16>, vector<48x8xf32> -> vector<48x8xf32>
    %72 = arith.addf %66, %71 : vector<48x8xf32>
    %73 = vector.extract_strided_slice %46 {offsets = [1, 1, 0], sizes = [6, 8, 128], strides = [1, 1, 1]} : vector<8x10x128xbf16> to vector<6x8x128xbf16>
    %74 = vector.shape_cast %73 : vector<6x8x128xbf16> to vector<48x128xbf16>
    %75 = vector.extract_strided_slice %47 {offsets = [1, 1, 0, 0], sizes = [1, 1, 128, 8], strides = [1, 1, 1, 1]} : vector<3x3x128x8xbf16> to vector<1x1x128x8xbf16>
    %76 = vector.shape_cast %75 : vector<1x1x128x8xbf16> to vector<128x8xbf16>
    %cst_19 = arith.constant dense<0.000000e+00> : vector<48x8xf32>
    %77 = tpu.matmul %74, %76, %cst_19 {dimension_numbers = #tpu.dot_dimension_numbers<[1], [0], [0], [1], [0, 0, 1, 1], [], []>} : vector<48x128xbf16>, vector<128x8xbf16>, vector<48x8xf32> -> vector<48x8xf32>
    %78 = arith.addf %72, %77 : vector<48x8xf32>
    %79 = vector.extract_strided_slice %46 {offsets = [1, 2, 0], sizes = [6, 8, 128], strides = [1, 1, 1]} : vector<8x10x128xbf16> to vector<6x8x128xbf16>
    %80 = vector.shape_cast %79 : vector<6x8x128xbf16> to vector<48x128xbf16>
    %81 = vector.extract_strided_slice %47 {offsets = [1, 2, 0, 0], sizes = [1, 1, 128, 8], strides = [1, 1, 1, 1]} : vector<3x3x128x8xbf16> to vector<1x1x128x8xbf16>
    %82 = vector.shape_cast %81 : vector<1x1x128x8xbf16> to vector<128x8xbf16>
    %cst_20 = arith.constant dense<0.000000e+00> : vector<48x8xf32>
    %83 = tpu.matmul %80, %82, %cst_20 {dimension_numbers = #tpu.dot_dimension_numbers<[1], [0], [0], [1], [0, 0, 1, 1], [], []>} : vector<48x128xbf16>, vector<128x8xbf16>, vector<48x8xf32> -> vector<48x8xf32>
    %84 = arith.addf %78, %83 : vector<48x8xf32>
    %85 = vector.extract_strided_slice %46 {offsets = [2, 0, 0], sizes = [6, 8, 128], strides = [1, 1, 1]} : vector<8x10x128xbf16> to vector<6x8x128xbf16>
    %86 = vector.shape_cast %85 : vector<6x8x128xbf16> to vector<48x128xbf16>
    %87 = vector.extract_strided_slice %47 {offsets = [2, 0, 0, 0], sizes = [1, 1, 128, 8], strides = [1, 1, 1, 1]} : vector<3x3x128x8xbf16> to vector<1x1x128x8xbf16>
    %88 = vector.shape_cast %87 : vector<1x1x128x8xbf16> to vector<128x8xbf16>
    %cst_21 = arith.constant dense<0.000000e+00> : vector<48x8xf32>
    %89 = tpu.matmul %86, %88, %cst_21 {dimension_numbers = #tpu.dot_dimension_numbers<[1], [0], [0], [1], [0, 0, 1, 1], [], []>} : vector<48x128xbf16>, vector<128x8xbf16>, vector<48x8xf32> -> vector<48x8xf32>
    %90 = arith.addf %84, %89 : vector<48x8xf32>
    %91 = vector.extract_strided_slice %46 {offsets = [2, 1, 0], sizes = [6, 8, 128], strides = [1, 1, 1]} : vector<8x10x128xbf16> to vector<6x8x128xbf16>
    %92 = vector.shape_cast %91 : vector<6x8x128xbf16> to vector<48x128xbf16>
    %93 = vector.extract_strided_slice %47 {offsets = [2, 1, 0, 0], sizes = [1, 1, 128, 8], strides = [1, 1, 1, 1]} : vector<3x3x128x8xbf16> to vector<1x1x128x8xbf16>
    %94 = vector.shape_cast %93 : vector<1x1x128x8xbf16> to vector<128x8xbf16>
    %cst_22 = arith.constant dense<0.000000e+00> : vector<48x8xf32>
    %95 = tpu.matmul %92, %94, %cst_22 {dimension_numbers = #tpu.dot_dimension_numbers<[1], [0], [0], [1], [0, 0, 1, 1], [], []>} : vector<48x128xbf16>, vector<128x8xbf16>, vector<48x8xf32> -> vector<48x8xf32>
    %96 = arith.addf %90, %95 : vector<48x8xf32>
    %97 = vector.extract_strided_slice %46 {offsets = [2, 2, 0], sizes = [6, 8, 128], strides = [1, 1, 1]} : vector<8x10x128xbf16> to vector<6x8x128xbf16>
    %98 = vector.shape_cast %97 : vector<6x8x128xbf16> to vector<48x128xbf16>
    %99 = vector.extract_strided_slice %47 {offsets = [2, 2, 0, 0], sizes = [1, 1, 128, 8], strides = [1, 1, 1, 1]} : vector<3x3x128x8xbf16> to vector<1x1x128x8xbf16>
    %100 = vector.shape_cast %99 : vector<1x1x128x8xbf16> to vector<128x8xbf16>
    %cst_23 = arith.constant dense<0.000000e+00> : vector<48x8xf32>
    %101 = tpu.matmul %98, %100, %cst_23 {dimension_numbers = #tpu.dot_dimension_numbers<[1], [0], [0], [1], [0, 0, 1, 1], [], []>} : vector<48x128xbf16>, vector<128x8xbf16>, vector<48x8xf32> -> vector<48x8xf32>
    %102 = arith.addf %96, %101 : vector<48x8xf32>
    %c0_24 = arith.constant 0 : index
    %c0_25 = arith.constant 0 : index
    %103 = vector.load %arg7[%c0_24, %c0_25] : memref<1x8xf32, #tpu.memory_space<vmem>>, vector<1x8xf32>
    %104 = vector.broadcast %103 : vector<1x8xf32> to vector<48x8xf32>
    %105 = arith.addf %102, %104 : vector<48x8xf32>
    %cst_26 = arith.constant 0.000000e+00 : f32
    %106 = vector.broadcast %cst_26 : f32 to vector<48x8xf32>
    %107 = arith.cmpf oge, %105, %106 : vector<48x8xf32>
    %108 = vector.broadcast %3 : f32 to vector<48x8xf32>
    %109 = arith.mulf %108, %105 : vector<48x8xf32>
    %110 = arith.select %107, %105, %109 : vector<48x8xi1>, vector<48x8xf32>
    %111 = vector.extract_strided_slice %7 {offsets = [2, 1, 0], sizes = [6, 8, 8], strides = [1, 1, 1]} : vector<10x10x8xf32> to vector<6x8x8xf32>
    %112 = vector.shape_cast %111 : vector<6x8x8xf32> to vector<48x8xf32>
    %113 = arith.subf %110, %112 : vector<48x8xf32>
    %114 = vector.shape_cast %113 : vector<48x8xf32> to vector<6x8x8xf32>
    %115 = tpu.iota {dimensions = array<i32: 0>} : vector<6x1x1xi32>
    %c1_i32 = arith.constant 1 : i32
    %116 = arith.subi %1, %c1_i32 : i32
    %117 = vector.broadcast %116 : i32 to vector<6x1x1xi32>
    %118 = arith.addi %115, %117 : vector<6x1x1xi32>
    %c0_i32_27 = arith.constant 0 : i32
    %119 = vector.broadcast %c0_i32_27 : i32 to vector<6x1x1xi32>
    %120 = arith.cmpi sge, %118, %119 : vector<6x1x1xi32>
    %c8_i32_28 = arith.constant 8 : i32
    %121 = vector.broadcast %c8_i32_28 : i32 to vector<6x1x1xi32>
    %122 = arith.cmpi slt, %118, %121 : vector<6x1x1xi32>
    %123 = arith.andi %120, %122 : vector<6x1x1xi1>
    %cst_29 = arith.constant 0.000000e+00 : f32
    %124 = vector.shape_cast %123 : vector<6x1x1xi1> to vector<6x1x1xi1>
    %125 = vector.broadcast %124 : vector<6x1x1xi1> to vector<6x8x8xi1>
    %126 = vector.broadcast %cst_29 : f32 to vector<6x8x8xf32>
    %127 = arith.select %125, %114, %126 : vector<6x8x8xi1>, vector<6x8x8xf32>
    %128 = arith.truncf %127 : vector<6x8x8xf32> to vector<6x8x8xbf16>
    %cst_30 = arith.constant 0.000000e+00 : bf16
    %129 = vector.broadcast %cst_30 : bf16 to vector<6x1x8xbf16>
    %130 = tpu.concatenate %129, %128, %129 in 1 : vector<6x1x8xbf16>, vector<6x8x8xbf16>, vector<6x1x8xbf16> -> vector<6x10x8xbf16>
    %131 = vector.extract_strided_slice %130 {offsets = [0, 0, 0], sizes = [4, 8, 8], strides = [1, 1, 1]} : vector<6x10x8xbf16> to vector<4x8x8xbf16>
    %132 = vector.extract_strided_slice %130 {offsets = [0, 1, 0], sizes = [4, 8, 8], strides = [1, 1, 1]} : vector<6x10x8xbf16> to vector<4x8x8xbf16>
    %133 = vector.extract_strided_slice %130 {offsets = [0, 2, 0], sizes = [4, 8, 8], strides = [1, 1, 1]} : vector<6x10x8xbf16> to vector<4x8x8xbf16>
    %134 = vector.extract_strided_slice %130 {offsets = [1, 0, 0], sizes = [4, 8, 8], strides = [1, 1, 1]} : vector<6x10x8xbf16> to vector<4x8x8xbf16>
    %135 = vector.extract_strided_slice %130 {offsets = [1, 1, 0], sizes = [4, 8, 8], strides = [1, 1, 1]} : vector<6x10x8xbf16> to vector<4x8x8xbf16>
    %136 = vector.extract_strided_slice %130 {offsets = [1, 2, 0], sizes = [4, 8, 8], strides = [1, 1, 1]} : vector<6x10x8xbf16> to vector<4x8x8xbf16>
    %137 = vector.extract_strided_slice %130 {offsets = [2, 0, 0], sizes = [4, 8, 8], strides = [1, 1, 1]} : vector<6x10x8xbf16> to vector<4x8x8xbf16>
    %138 = vector.extract_strided_slice %130 {offsets = [2, 1, 0], sizes = [4, 8, 8], strides = [1, 1, 1]} : vector<6x10x8xbf16> to vector<4x8x8xbf16>
    %139 = vector.extract_strided_slice %130 {offsets = [2, 2, 0], sizes = [4, 8, 8], strides = [1, 1, 1]} : vector<6x10x8xbf16> to vector<4x8x8xbf16>
    %140 = tpu.concatenate %131, %132, %133, %134, %135, %136, %137, %138, %139 in 2 : vector<4x8x8xbf16>, vector<4x8x8xbf16>, vector<4x8x8xbf16>, vector<4x8x8xbf16>, vector<4x8x8xbf16>, vector<4x8x8xbf16>, vector<4x8x8xbf16>, vector<4x8x8xbf16>, vector<4x8x8xbf16> -> vector<4x8x72xbf16>
    %141 = vector.shape_cast %140 : vector<4x8x72xbf16> to vector<32x72xbf16>
    %c0_31 = arith.constant 0 : index
    %c0_32 = arith.constant 0 : index
    %142 = vector.load %arg8[%c0_31, %c0_32] : memref<72x128xbf16, #tpu.memory_space<vmem>>, vector<72x128xbf16>
    %cst_33 = arith.constant dense<0.000000e+00> : vector<32x128xf32>
    %143 = tpu.matmul %141, %142, %cst_33 {dimension_numbers = #tpu.dot_dimension_numbers<[1], [0], [0], [1], [0, 0, 1, 1], [], []>} : vector<32x72xbf16>, vector<72x128xbf16>, vector<32x128xf32> -> vector<32x128xf32>
    %c0_34 = arith.constant 0 : index
    %c0_35 = arith.constant 0 : index
    %144 = vector.load %arg9[%c0_34, %c0_35] : memref<1x128xf32, #tpu.memory_space<vmem>>, vector<1x128xf32>
    %145 = vector.broadcast %144 : vector<1x128xf32> to vector<32x128xf32>
    %146 = arith.addf %143, %145 : vector<32x128xf32>
    %cst_36 = arith.constant 0.000000e+00 : f32
    %147 = vector.broadcast %cst_36 : f32 to vector<32x128xf32>
    %148 = arith.cmpf oge, %146, %147 : vector<32x128xf32>
    %149 = vector.broadcast %4 : f32 to vector<32x128xf32>
    %150 = arith.mulf %149, %146 : vector<32x128xf32>
    %151 = arith.select %148, %146, %150 : vector<32x128xi1>, vector<32x128xf32>
    %152 = vector.extract_strided_slice %43 {offsets = [2, 0, 0], sizes = [4, 8, 128], strides = [1, 1, 1]} : vector<8x8x128xf32> to vector<4x8x128xf32>
    %153 = vector.shape_cast %152 : vector<4x8x128xf32> to vector<32x128xf32>
    %154 = arith.addf %151, %153 : vector<32x128xf32>
    %155 = vector.shape_cast %154 : vector<32x128xf32> to vector<4x8x128xf32>
    %c0_37 = arith.constant 0 : index
    %c0_38 = arith.constant 0 : index
    %c0_39 = arith.constant 0 : index
    %c0_40 = arith.constant 0 : index
    %156 = vector.load %arg10[%c0_37, %c0_38, %c0_39, %c0_40] : memref<1x4x8x128xf32, #tpu.memory_space<vmem>>, vector<1x4x8x128xf32>
    %157 = vector.shape_cast %156 : vector<1x4x8x128xf32> to vector<4x8x128xf32>
    %158 = vector.shape_cast %155 : vector<4x8x128xf32> to vector<1x4x8x128xf32>
    tpu.vector_store %arg10[%c0_37, %c0_38, %c0_39, %c0_40], %158 {strides = array<i32>} : memref<1x4x8x128xf32, #tpu.memory_space<vmem>>, vector<1x4x8x128xf32>,
    return
  }
  func.func @transform_0(%arg0: i32, %arg1: i32) -> i32 {
    %c0_i32 = arith.constant 0 : i32
    %c0_i32_0 = arith.constant 0 : i32
    return %c0_i32 : i32
  }
  func.func @transform_1(%arg0: i32, %arg1: i32) -> (i32, i32, i32, i32) {
    %c0_i32 = arith.constant 0 : i32
    %c0_i32_0 = arith.constant 0 : i32
    %c0_i32_1 = arith.constant 0 : i32
    %c0_i32_2 = arith.constant 0 : i32
    return %arg0, %c0_i32, %c0_i32_0, %c0_i32_1 : i32, i32, i32, i32
  }
  func.func @transform_2(%arg0: i32, %arg1: i32) -> (i32, i32) {
    %c0_i32 = arith.constant 0 : i32
    %c0_i32_0 = arith.constant 0 : i32
    %c0_i32_1 = arith.constant 0 : i32
    return %c0_i32, %c0_i32_0 : i32, i32
  }
  func.func @transform_3(%arg0: i32, %arg1: i32) -> (i32, i32) {
    %c0_i32 = arith.constant 0 : i32
    %c0_i32_0 = arith.constant 0 : i32
    %c0_i32_1 = arith.constant 0 : i32
    return %c0_i32, %c0_i32_0 : i32, i32
  }
  func.func @transform_4(%arg0: i32, %arg1: i32) -> (i32, i32, i32, i32) {
    %c0_i32 = arith.constant 0 : i32
    %c0_i32_0 = arith.constant 0 : i32
    %c0_i32_1 = arith.constant 0 : i32
    %c0_i32_2 = arith.constant 0 : i32
    %c0_i32_3 = arith.constant 0 : i32
    return %c0_i32, %c0_i32_0, %c0_i32_1, %c0_i32_2 : i32, i32, i32, i32
  }
  func.func @transform_5(%arg0: i32, %arg1: i32) -> (i32, i32) {
    %c0_i32 = arith.constant 0 : i32
    %c0_i32_0 = arith.constant 0 : i32
    %c0_i32_1 = arith.constant 0 : i32
    return %c0_i32, %c0_i32_0 : i32, i32
  }
  func.func @transform_6(%arg0: i32, %arg1: i32) -> (i32, i32) {
    %c0_i32 = arith.constant 0 : i32
    %c0_i32_0 = arith.constant 0 : i32
    %c0_i32_1 = arith.constant 0 : i32
    return %c0_i32, %c0_i32_0 : i32, i32
  }
  func.func @transform_7(%arg0: i32, %arg1: i32) -> (i32, i32) {
    %c0_i32 = arith.constant 0 : i32
    %c0_i32_0 = arith.constant 0 : i32
    %c0_i32_1 = arith.constant 0 : i32
    return %c0_i32, %c0_i32_0 : i32, i32
  }
  func.func @transform_8(%arg0: i32, %arg1: i32) -> (i32, i32, i32, i32) {
    %c0_i32 = arith.constant 0 : i32
    %c0_i32_0 = arith.constant 0 : i32
    %c0_i32_1 = arith.constant 0 : i32
    return %arg0, %arg1, %c0_i32, %c0_i32_0 : i32, i32, i32, i32
  }
}

</mosaic_0001>

<bundles_post_ra>
// kernel: upblock_pallas.1
= control target key start
LH: loop header
LB: loop body
LE: loop exit
PB: predicated region body
PF: predicated region fallthrough
CT: control target
= control target key end

     0   :  { %13 = vsyncpa [#allocation3], 0  ;;  %s3864_s27 = smov 0   ;;  %s3866_s28 = smov 0   ;;  %s5095_s0 = inlined_call_operand.vmem [shape: f32[3], index: 0, kind: input, shape index: {}]   ;;  %s5096_s1 = inlined_call_operand.vmem [shape: f32[2,14,10,8], index: 1, kind: input, shape index: {}]   ;;  %s5097_s2 = inlined_call_operand.vmem [shape: bf16[72,128], index: 2, kind: input, shape index: {}]   ;;  %s5098_s3 = inlined_call_operand.vmem [shape: f32[1,128], index: 3, kind: input, shape index: {}]   ;;  %s5099_s4 = inlined_call_operand.vmem [shape: bf16[3,3,128,8], index: 4, kind: input, shape index: {}]   ;;  %s5100_s5 = inlined_call_operand.vmem [shape: f32[1,8], index: 5, kind: input, shape index: {}]   ;;  %s5101_s6 = inlined_call_operand.vmem [shape: bf16[72,128], index: 6, kind: input, shape index: {}]   ;;  %s5102_s7 = inlined_call_operand.vmem [shape: f32[1,128], index: 7, kind: input, shape index: {}]   ;;  %s5103_s8 = inlined_call_operand.vmem [shape: f32[2,8,8,128], index: 8, kind: output, shape index: {}]  }
   0x1   :  { %s3868_s29 = smov 0   ;;  %s3870_s30 = smov 0  }
   0x2   :  { %s3872_s9 = smov 0  }
   0x3 LB: > { %s3030_s10 = sadd.s32 4294967295, %s3806_s9   ;;  %s28_s11 = sadd.s32 1, %s3798_s29  ;;  %s3806_s9 = sphi %s3872_s9, %s19_s9   ;;  %s3802_s30 = sphi %s3870_s30, %s5166_s30   ;;  %s3798_s29 = sphi %s3868_s29, %s5165_s29   ;;  %s3794_s28 = sphi %s3866_s28, %s5164_s28   ;;  %s3790_s27 = sphi %s3864_s27, %s5163_s27  }
   0x4   : > { %p29_p0 = scmp.ge.s32.totalorder %s28_s11, 2  ;;  %s31_s12 = sadd.s32 1, %s3802_s30 }
   0x5   : > { %p3032_p1 = scmp.ge.s32.totalorder %s3806_s9, 1  ;;  %p237_p2 = scmp.lt.s32.totalorder %s3806_s9, 5 }
   0x6   : > { %s5168_s11 = smov (%p29_p0, %s28_s11), 0  ;;  %s5170_s12 = smov (!%p29_p0, %s31_s12), %s3802_s30 }
   0x7   : > { %p3897_p3 = pnand %p3032_p1, %p237_p2  ;;  %p33_p4 = scmp.ge.s32.totalorder %s5170_s12, 2 }
   0x8   : > { %p3901_p5 = scmp.eq.s32.totalorder %s3030_s10, 0  ;;  %s250_s17 = sshll.u32 %s5095_s0, 4  ;;  %s251_s17 = int_to_ptr.vmem [resolvable:$true] %s250_s17 }
   0x9   : > { %p3598_p6 = pneg %p3897_p3  ;;  %s5172_s12 = smov (%p33_p4, %s5170_s12), 0 }
   0xa   : > { %s3749_s18 = scalar_lea.vmem %s251_s17, 16  ;;  %p3757_p12 = scmp.lt.s32.totalorder %s251_s17, %s251_s17 }
   0xb   : > { %p3599_p7 = pnand %p3901_p5, %p3598_p6  ;;  %p3750_p8 = scmp.ne.s32.totalorder %s251_s17, %s3749_s18 }
   0xc   : > { %p3758_p13 = scmp.lt.s32.totalorder %s3749_s18, %s3749_s18 }
   0xd   : > { %p3751_p9 = pneg %p3599_p7 }
   0xe   : > { %p3759_p0 = por %p3758_p13, %p3757_p12 }
   0xf   : > { %p3752_p10 = pnand %p3751_p9, %p3750_p8 }
  0x11   : > { %p3753_p11 = pneg %p3752_p10 }
  0x13   : > { %p3760_p1 = pnand %p3759_p0, %p3753_p11 }
  0x15   : > { %3763 = shalt.err (!%p3760_p1)
}
  0x16   : > { %s3808_s19 = smov [#allocation2]   ;;  %289 = sbr.rel (%p3897_p3) target bundleno = 1220 (0x4c4), region = 52 }
  0x17   : > { %3601 = dma.vmem_to_smem (!%p3599_p7), %s251_s17, 16, %s3808_s19, [#allocation3]  }
  0x1b   : > { %3785 = dma.done.wait (%p3901_p5), [#allocation3], 16  }
  0x1c   : > { %3787 = vsyncadd (%p3901_p5), [#allocation3], 4294967280 }
  0x1d   : > { %295 = sfence }
  0x1e   : > { %p328_p2 = scmp.lt.s32.totalorder %s3794_s28, 1  ;;  %s3191_s21 = sshll.u32 %s3790_s27, 6  ;;  %v3655_v48 = vld [vmem:[%s5097_s2 + $0x20] ss:$0 sps:$4 sm:$0xff]   ;;  %vm5117_vm0 = vcmask 1043456   ;;  %v3656_v55 = vld [vmem:[%s5097_s2 + $0x18] sm:$0xff]  }
  0x1f   : > { %s3809_s26 = smov 24   ;;  %s3810_s10 = smov 16   ;;  %3591 = vmatprep.subr.msk.bf16.mxu0 %vm5117_vm0, %v3655_v48  ;;  %v812_v53 = vsel %vm5117_vm0, %v3655_v48, 0  ;;  %v3657_v58 = vld [vmem:[%s5097_s2 + $0x10] sm:$0xff]   ;;  %v3658_v60 = vld [vmem:[%s5097_s2 + $0x8] sm:$0xff]   ;;  %v3659_v62 = vld [vmem:[%s5097_s2] sm:$0xff]  }
  0x20   : > { %s5174_s28 = smov (!%p328_p2, %s3794_s28), 1  ;;  %s3811_s13 = smov 8   ;;  %3308 = vmatpush3.bf16.msra.mxu0 %v812_v53  ;;  %vm5116_vm1 = vcmask 64512   ;;  %vm5115_vm2 = vcmask 130048   ;;  %vm5114_vm3 = vcmask 195584   ;;  %vm5113_vm4 = vcmask 261120  }
  0x21   : > { %s3593_s20 = smul.u32 224, %s5174_s28  ;;  %s3812_s14 = smov 32   ;;  %3309 = vmatprep.subr.bf16.mxu0 %v3656_v55  ;;  %vm5112_vm5 = vcmask 326656   ;;  %vm5111_vm6 = vcmask 392192   ;;  %vm5110_vm7 = vcmask 457728   ;;  %vm5109_vm8 = vcmask 523264  }
  0x22   : > { %s3813_s17 = smov 40   ;;  %s3814_s22 = smov 48   ;;  %vm5108_vm9 = vcmask 588800   ;;  %vm3818_vm10 = vmmov 0  }
  0x23   : > { %s332_s24 = scalar_lea.vmem %s5096_s1, %s3593_s20  ;;  %s5104_s18 = smov 56  }
  0x24   : > { %s3929_s25 = scalar_lea.vmem %s332_s24, %s3191_s21  ;;  %3310 = vmatpush3.bf16.msra.mxu0 %v3656_v55  ;;  %s5106_s19 = smov 64  }
  0x25   : > { %v354_v0 = vld [vmem:[%s3929_s25 + $0x20] sm:$0xff]  ;;  %v355_v1 = vld [vmem:[%s3929_s25 + $0x28] sm:$0x3]  ;;  %v352_v2 = vld [vmem:[%s3929_s25 + $0x10] sm:$0xff]  ;;  %3311 = vmatprep.subr.bf16.mxu0 %v3657_v58  ;;  %s4261_s23 = sshll.u32 %s3790_s27, 2  ;;  %s3042_s27 = sld [smem:[#allocation2 + $0x1]] }
  0x26   : > { %v3934_v3 = vpack.c.bf16 %v355_v1, %v354_v0  ;;  %v353_v4 = vld [vmem:[%s3929_s25 + $0x18] sm:$0x3]  ;;  %v350_v5 = vld [vmem:[%s3929_s25] sm:$0xff]  ;;  %v351_v6 = vld [vmem:[%s3929_s25 + $0x8] sm:$0x3]  ;;  %s3059_s24 = sadd.s32 4294967294, %s4261_s23 }
  0x27   : > { %v3939_v7 = vpack.c.bf16 %v353_v4, %v352_v2  ;;  %v3941_v8 = vpack.c.bf16 %v351_v6, %v350_v5  ;;  %v356_v9 = vld [vmem:[%s3929_s25 + $0x30] sm:$0xff]  ;;  %v357_v10 = vld [vmem:[%s3929_s25 + $0x38] sm:$0x3]  ;;  %v358_v24 = vld [vmem:[%s3929_s25 + $0x40] sm:$0xff]  ;;  %s3178_s16 = sadd.s32 4294967295, %s4261_s23  ;;  %p336_p3 = scmp.lt.s32.totalorder %s4261_s23, 7 }
  0x28   : > { %487 = vrot.lane.b32.xlu1 %v3934_v3, %s3809_s26  ;;  %v3947_v11 = vpack.c.bf16 %v357_v10, %v356_v9  ;;  %v397_v12 = vshll.u32 %v3934_v3, 16  ;;  %v395_v17 = vshrl.u32 %v3934_v3, 16  ;;  %v3965_v20 = vrot.slane %v3934_v3, 1  ;;  %v359_v25 = vld [vmem:[%s3929_s25 + $0x48] sm:$0x3]  ;;  %v360_v39 = vld [vmem:[%s3929_s25 + $0x50] sm:$0xff]  ;;  %3312 = vmatpush3.bf16.msra.mxu0 %v3657_v58 }
  0x29   : > { %485 = vrot.lane.b32.xlu0 %v3939_v7, %s3809_s26  ;;  %v461_v13 = vrot.slane %v3939_v7, 1  ;;  %v460_v14 = vrot.slane %v3941_v8, 1  ;;  %v383_v15 = vshll.u32 %v3941_v8, 16  ;;  %v381_v21 = vshrl.u32 %v3941_v8, 16  ;;  %v361_v40 = vld [vmem:[%s3929_s25 + $0x58] sm:$0x3]  ;;  %3313 = vmatprep.subr.bf16.mxu0 %v3658_v60 }
  0x2a   : > { %v3959_v16 = vrot.slane %v3947_v11, 1  ;;  %v399_v18 = vrot.slane %v397_v12, 1  ;;  %v404_v19 = vshll.u32 %v3947_v11, 16  ;;  %v390_v23 = vshll.u32 %v3939_v7, 16  ;;  %v364_v45 = vld [vmem:[%s3929_s25 + $0x70] sm:$0xff]  ;;  %v362_v51 = vld [vmem:[%s3929_s25 + $0x60] sm:$0xff] }
  0x2b   : > { %v385_v22 = vrot.slane %v383_v15, 1  ;;  %v402_v27 = vshrl.u32 %v3947_v11, 16  ;;  %v388_v30 = vshrl.u32 %v3939_v7, 16  ;;  %v3979_v32 = vpack.c.bf16 %v359_v25, %v358_v24  ;;  %v365_v46 = vld [vmem:[%s3929_s25 + $0x78] sm:$0x3]  ;;  %v366_v9 = vld [vmem:[%s3929_s25 + $0x80] sm:$0xff] }
  0x2c   : > { %470 = vrot.lane.b32.xlu1 %v461_v13, %s3810_s10  ;;  %v3973_v26 = vor.u32 %v399_v18, %v395_v17  ;;  %v406_v28 = vrot.slane %v404_v19, 1  ;;  %v392_v31 = vrot.slane %v390_v23, 1  ;;  %v3997_v41 = vpack.c.bf16 %v361_v40, %v360_v39  ;;  %v363_v52 = vld [vmem:[%s3929_s25 + $0x68] sm:$0x3]  ;;  %3314 = vmatpush3.bf16.msra.mxu0 %v3658_v60  ;;  %v368_v18 = vld [vmem:[%s3929_s25 + $0x90] sm:$0xff]  ;;  %s5176_s23 = smov (!%p336_p3, %s4261_s23), 7 }
  0x2d   : > { %468 = vrot.lane.b32.xlu0 %v460_v14, %s3810_s10  ;;  %v386_v29 = vor.u32 %v385_v22, %v381_v21  ;;  %v411_v34 = vshll.u32 %v3979_v32, 16  ;;  %v409_v36 = vshrl.u32 %v3979_v32, 16  ;;  %v3988_v38 = vrot.slane %v3979_v32, 1  ;;  %3315 = vmatprep.subr.bf16.mxu0 %v3659_v62  ;;  %v367_v10 = vld [vmem:[%s3929_s25 + $0x88] sm:$0x3] }
  0x2e   : > { %v407_v33 = vor.u32 %v406_v28, %v402_v27  ;;  %v393_v35 = vor.u32 %v392_v31, %v388_v30  ;;  %v416_v43 = vshrl.u32 %v3997_v41, 16  ;;  %v418_v44 = vshll.u32 %v3997_v41, 16  ;;  %v369_v19 = vld [vmem:[%s3929_s25 + $0x98] sm:$0x3] }
  0x2f   : > { %v413_v37 = vrot.slane %v411_v34, 1  ;;  %v4008_v47 = vrot.slane %v3997_v41, 1  ;;  %v4014_v49 = vpack.c.bf16 %v365_v46, %v364_v45  ;;  %v4032_v57 = vpack.c.bf16 %v363_v52, %v362_v51 }
  0x30   : > { %474 = vrot.lane.b32.xlu1 %v3959_v16, %s3810_s10  ;;  %v420_v54 = vrot.slane %v418_v44, 1  ;;  %3316 = vmatpush3.bf16.msra.mxu0 %v3659_v62  ;;  %v378_v12 = vpack.c.bf16 %v367_v10, %v366_v9  ;;  %v3817_v27 = vmov 0.0  }
  0x31   : > { %472 = vrot.lane.b32.xlu0 %v3965_v20, %s3810_s10  ;;  %v414_v42 = vor.u32 %v413_v37, %v409_v36  ;;  %v430_v50 = vshrl.u32 %v4014_v49, 16  ;;  %v432_v56 = vshll.u32 %v4014_v49, 16  ;;  %v425_v59 = vshll.u32 %v4032_v57, 16  ;;  %3353 = vmatprep.subr.bf16.mxu0 %v3817_v27 }
  0x32   : > { %v423_v63 = vshrl.u32 %v4032_v57, 16  ;;  %v421_v1 = vor.u32 %v420_v54, %v416_v43  ;;  %v467_v5 = vrot.slane %v4014_v49, 1  ;;  %v466_v6 = vrot.slane %v4032_v57, 1  ;;  %3325 = vmatprep.subr.bf16.mxu1 %v3817_v27  ;;  %3341 = vmatprep.mubr.msk.bf16.mxu1 %vm3818_vm10, %v3817_v27 }
  0x33   : > { %v434_v61 = vrot.slane %v432_v56, 1  ;;  %v427_v0 = vrot.slane %v425_v59, 1  ;;  %v502_v14 = vshrl.u32 %v378_v12, 16  ;;  %v524_v17 = vrot.slane %v378_v12, 1 }
  0x34   : > { %440 = vrot.lane.b32.xlu1 %v3973_v26, %s3811_s13 }
  0x35   : > { %436 = vrot.lane.b32.xlu0 %v386_v29, %s3811_s13  ;;  %v435_v2 = vor.u32 %v434_v61, %v430_v50  ;;  %v428_v4 = vor.u32 %v427_v0, %v423_v63 }
  0x38   : > { %442 = vrot.lane.b32.xlu1 %v407_v33, %s3811_s13 }
  0x39   : > { %438 = vrot.lane.b32.xlu0 %v393_v35, %s3811_s13 }
  0x3c   : > { %491 = vrot.lane.b32.xlu1 %v3979_v32, %s3809_s26 }
  0x3d   : > { %489 = vrot.lane.b32.xlu0 %v3947_v11, %s3809_s26 }
  0x40   : > { %510 = vrot.lane.b32.xlu1 %v3973_v26, %s3812_s14 }
  0x41   : > { %508 = vrot.lane.b32.xlu0 %v393_v35, %s3812_s14 }
  0x44   : > { %514 = vrot.lane.b32.xlu1 %v414_v42, %s3812_s14 }
  0x45   : > { %512 = vrot.lane.b32.xlu0 %v407_v33, %s3812_s14 }
  0x48   : > { %527 = vrot.lane.b32.xlu1 %v3965_v20, %s3813_s17 }
  0x49   : > { %525 = vrot.lane.b32.xlu0 %v461_v13, %s3813_s17  ;;  %v504_v13 = vshll.u32 %v378_v12, 16 }
  0x4b   : > { %v506_v15 = vrot.slane %v504_v13, 1 }
  0x4c   : > { %531 = vrot.lane.b32.xlu1 %v3988_v38, %s3813_s17 }
  0x4d   : > { %529 = vrot.lane.b32.xlu0 %v3959_v16, %s3813_s17 }
  0x50   : > { %544 = vrot.lane.b32.xlu1 %v3947_v11, %s3814_s22 }
  0x51   : > { %542 = vrot.lane.b32.xlu0 %v3934_v3, %s3814_s22 }
  0x54   : > { %548 = vrot.lane.b32.xlu1 %v3997_v41, %s3814_s22 }
  0x55   : > { %546 = vrot.lane.b32.xlu0 %v3979_v32, %s3814_s22 }
  0x58   : > { %567 = vrot.lane.b32.xlu1 %v407_v33, %s5104_s18 }
  0x59   : > { %565 = vrot.lane.b32.xlu0 %v3973_v26, %s5104_s18 }
  0x5c   : > { %571 = vrot.lane.b32.xlu1 %v421_v1, %s5104_s18 }
  0x5d   : > { %569 = vrot.lane.b32.xlu0 %v414_v42, %s5104_s18 }
  0x60   : > { %584 = vrot.lane.b32.xlu1 %v3959_v16, %s5106_s19  ;;  %v507_v16 = vor.u32 %v506_v15, %v502_v14 }
  0x61   : > { %582 = vrot.lane.b32.xlu0 %v3965_v20, %s5106_s19  ;;  %v379_v20 = vpack.c.bf16 %v369_v19, %v368_v18 }
  0x63   : > { %v561_v21 = vshll.u32 %v379_v20, 16  ;;  %v559_v22 = vshrl.u32 %v379_v20, 16  ;;  %v581_v30 = vrot.slane %v379_v20, 1 }
  0x64   : > { %588 = vrot.lane.b32.xlu1 %v4008_v47, %s5106_s19 }
  0x65   : > { %586 = vrot.lane.b32.xlu0 %v3988_v38, %s5106_s19  ;;  %v563_v23 = vrot.slane %v561_v21, 1 }
  0x67   : > { %v564_v24 = vor.u32 %v563_v23, %v559_v22 }
  0x68   : > { %446 = vrot.lane.b32.xlu1 %v421_v1, %s3811_s13 }
  0x69   : > { %444 = vrot.lane.b32.xlu0 %v414_v42, %s3811_s13 }
  0x6c   : > { %450 = vrot.lane.b32.xlu1 %v435_v2, %s3811_s13 }
  0x6d   : > { %448 = vrot.lane.b32.xlu0 %v428_v4, %s3811_s13 }
  0x70   : > { %478 = vrot.lane.b32.xlu1 %v4008_v47, %s3810_s10 }
  0x71   : > { %476 = vrot.lane.b32.xlu0 %v3988_v38, %s3810_s10 }
  0x74   : > { %482 = vrot.lane.b32.xlu1 %v467_v5, %s3810_s10 }
  0x75   : > { %480 = vrot.lane.b32.xlu0 %v466_v6, %s3810_s10 }
  0x78   : > { %495 = vrot.lane.b32.xlu1 %v4032_v57, %s3809_s26 }
  0x79   : > { %493 = vrot.lane.b32.xlu0 %v3997_v41, %s3809_s26 }
  0x7c   : > { %499 = vrot.lane.b32.xlu1 %v378_v12, %s3809_s26 }
  0x7d   : > { %497 = vrot.lane.b32.xlu0 %v4014_v49, %s3809_s26 }
  0x80   : > { %518 = vrot.lane.b32.xlu1 %v428_v4, %s3812_s14 }
  0x81   : > { %516 = vrot.lane.b32.xlu0 %v421_v1, %s3812_s14 }
  0x84   : > { %522 = vrot.lane.b32.xlu1 %v507_v16, %s3812_s14 }
  0x85   : > { %520 = vrot.lane.b32.xlu0 %v435_v2, %s3812_s14 }
  0x88   : > { %535 = vrot.lane.b32.xlu1 %v466_v6, %s3813_s17 }
  0x89   : > { %533 = vrot.lane.b32.xlu0 %v4008_v47, %s3813_s17 }
  0x8c   : > { %539 = vrot.lane.b32.xlu1 %v524_v17, %s3813_s17 }
  0x8d   : > { %537 = vrot.lane.b32.xlu0 %v467_v5, %s3813_s17 }
  0x90   : > { %552 = vrot.lane.b32.xlu1 %v4014_v49, %s3814_s22 }
  0x91   : > { %550 = vrot.lane.b32.xlu0 %v4032_v57, %s3814_s22 }
  0x94   : > { %556 = vrot.lane.b32.xlu1 %v379_v20, %s3814_s22 }
  0x95   : > { %554 = vrot.lane.b32.xlu0 %v378_v12, %s3814_s22 }
  0x98   : > { %575 = vrot.lane.b32.xlu1 %v435_v2, %s5104_s18 }
  0x99   : > { %573 = vrot.lane.b32.xlu0 %v428_v4, %s5104_s18 }
  0x9a   : > { %v488_v25 = vpop.permute.xlu1 %487 }
  0x9b   : > { %v486_v26 = vpop.permute.xlu0 %485 }
  0x9c   : > { %579 = vrot.lane.b32.xlu1 %v564_v24, %s5104_s18 }
  0x9d   : > { %577 = vrot.lane.b32.xlu0 %v507_v16, %s5104_s18  ;;  %s345_s18 = sld [smem:[#allocation2]] }
  0x9e   : > { %v471_v28 = vpop.permute.xlu1 %470 }
  0x9f   : > { %v469_v29 = vpop.permute.xlu0 %468 }
  0xa0   : > { %592 = vrot.lane.b32.xlu1 %v467_v5, %s5106_s19 }
  0xa1   : > { %590 = vrot.lane.b32.xlu0 %v466_v6, %s5106_s19 }
  0xa2   : > { %v475_v31 = vpop.permute.xlu1 %474 }
  0xa3   : > { %v473_v33 = vpop.permute.xlu0 %472 }
  0xa4   : > { %596 = vrot.lane.b32.xlu1 %v581_v30, %s5106_s19 }
  0xa5   : > { %594 = vrot.lane.b32.xlu0 %v524_v17, %s5106_s19 }
  0xa6   : > { %v441_v34 = vpop.permute.xlu1 %440 }
  0xa7   : > { %v437_v35 = vpop.permute.xlu0 %436  ;;  %v604_v63 = vsel %vm5116_vm1, %v3934_v3, %v441_v34  ;;  %v3660_v34 = vld [vmem:[%s5099_s4 + $0x38] sm:$0xff]  }
  0xa8   : > { %v600_v55 = vsel %vm5116_vm1, %v3941_v8, %v437_v35  ;;  %v621_v3 = vsel %vm5115_vm2, %v604_v63, %v473_v33 }
  0xa9   : > { %v617_v60 = vsel %vm5115_vm2, %v600_v55, %v469_v29 }
  0xaa   : > { %v443_v36 = vpop.permute.xlu1 %442  ;;  %v634_v0 = vsel %vm5114_vm3, %v617_v60, %v486_v26 }
  0xab   : > { %v439_v37 = vpop.permute.xlu0 %438  ;;  %v606_v61 = vsel %vm5116_vm1, %v3947_v11, %v443_v36 }
  0xac   : > { %v602_v54 = vsel %vm5116_vm1, %v3939_v7, %v439_v37  ;;  %v623_v11 = vsel %vm5115_vm2, %v606_v61, %v475_v31 }
  0xad   : > { %v619_v58 = vsel %vm5115_vm2, %v602_v54, %v471_v28 }
  0xae   : > { %v492_v38 = vpop.permute.xlu1 %491  ;;  %v636_v62 = vsel %vm5114_vm3, %v619_v58, %v488_v25 }
  0xaf   : > { %v490_v39 = vpop.permute.xlu0 %489  ;;  %v640_v9 = vsel %vm5114_vm3, %v623_v11, %v492_v38  ;;  %v3661_v38 = vld [vmem:[%s5099_s4 + $0x30] sm:$0xff]  }
  0xb0   : > { %v638_v14 = vsel %vm5114_vm3, %v621_v3, %v490_v39 }
  0xb2   : > { %v511_v40 = vpop.permute.xlu1 %510 }
  0xb3   : > { %v509_v42 = vpop.permute.xlu0 %508  ;;  %v653_v8 = vsel %vm5113_vm4, %v636_v62, %v511_v40 }
  0xb4   : > { %v651_v2 = vsel %vm5113_vm4, %v634_v0, %v509_v42 }
  0xb6   : > { %v515_v43 = vpop.permute.xlu1 %514 }
  0xb7   : > { %v513_v44 = vpop.permute.xlu0 %512  ;;  %v657_v15 = vsel %vm5113_vm4, %v640_v9, %v515_v43 }
  0xb8   : > { %v655_v19 = vsel %vm5113_vm4, %v638_v14, %v513_v44 }
  0xba   : > { %v528_v45 = vpop.permute.xlu1 %527 }
  0xbb   : > { %v526_v46 = vpop.permute.xlu0 %525  ;;  %v670_v4 = vsel %vm5112_vm5, %v653_v8, %v528_v45 }
  0xbc   : > { %v668_v5 = vsel %vm5112_vm5, %v651_v2, %v526_v46 }
  0xbe   : > { %v532_v47 = vpop.permute.xlu1 %531 }
  0xbf   : > { %v530_v48 = vpop.permute.xlu0 %529  ;;  %v674_v20 = vsel %vm5112_vm5, %v657_v15, %v532_v47 }
  0xc0   : > { %v672_v22 = vsel %vm5112_vm5, %v655_v19, %v530_v48 }
  0xc2   : > { %v545_v50 = vpop.permute.xlu1 %544 }
  0xc3   : > { %v543_v51 = vpop.permute.xlu0 %542  ;;  %v687_v6 = vsel %vm5111_vm6, %v670_v4, %v545_v50 }
  0xc4   : > { %v685_v10 = vsel %vm5111_vm6, %v668_v5, %v543_v51 }
  0xc6   : > { %v549_v52 = vpop.permute.xlu1 %548 }
  0xc7   : > { %v547_v53 = vpop.permute.xlu0 %546  ;;  %v691_v23 = vsel %vm5111_vm6, %v674_v20, %v549_v52 }
  0xc8   : > { %v689_v25 = vsel %vm5111_vm6, %v672_v22, %v547_v53 }
  0xca   : > { %v568_v56 = vpop.permute.xlu1 %567 }
  0xcb   : > { %v566_v59 = vpop.permute.xlu0 %565  ;;  %v704_v12 = vsel %vm5110_vm7, %v687_v6, %v568_v56 }
  0xcc   : > { %v702_v16 = vsel %vm5110_vm7, %v685_v10, %v566_v59 }
  0xce   : > { %v572_v7 = vpop.permute.xlu1 %571 }
  0xcf   : > { %v570_v1 = vpop.permute.xlu0 %569  ;;  %v708_v26 = vsel %vm5110_vm7, %v691_v23, %v572_v7 }
  0xd0   : > { %v706_v29 = vsel %vm5110_vm7, %v689_v25, %v570_v1 }
  0xd2   : > { %v585_v13 = vpop.permute.xlu1 %584 }
  0xd3   : > { %v721_v17 = vsel %vm5109_vm8, %v704_v12, %v585_v13  ;;  %v583_v18 = vpop.permute.xlu0 %582 }
  0xd4   : > { %v719_v21 = vsel %vm5109_vm8, %v702_v16, %v583_v18 }
  0xd5   : > { %v3046_v24 = vcombine.low %v719_v21, %v721_v17 }
  0xd6   : > { %v589_v28 = vpop.permute.xlu1 %588 }
  0xd7   : > { %v725_v30 = vsel %vm5109_vm8, %v708_v26, %v589_v28  ;;  %3317 = vmatprep.mubr.msk.bf16.mxu0 %vm5108_vm9, %v3046_v24  ;;  %v587_v31 = vpop.permute.xlu0 %586 }
  0xd8   : > { %v723_v33 = vsel %vm5109_vm8, %v706_v29, %v587_v31 }
  0xd9   : > { %v3047_v35 = vcombine.low %v723_v33, %v725_v30 }
  0xda   : > { %v447_v36 = vpop.permute.xlu1 %446 }
  0xdb   : > { %3318 = vmatmul.mubr.msk.bf16.vlgmr.msra.gmra.mxu0 %vm5108_vm9, %v3047_v35  ;;  %v445_v37 = vpop.permute.xlu0 %444  ;;  %v610_v0 = vsel %vm5116_vm1, %v3997_v41, %v447_v36 }
  0xdc   : > { %3354 = vmatpush3.bf16.msra.mxu0 %v3660_v34  ;;  %v608_v1 = vsel %vm5116_vm1, %v3979_v32, %v445_v37 }
  0xdd   : > { %3355 = vmatprep.subr.bf16.mxu0 %v3817_v27 }
  0xde   : > { %v451_v39 = vpop.permute.xlu1 %450 }
  0xdf   : > { %v449_v40 = vpop.permute.xlu0 %448  ;;  %v614_v10 = vsel %vm5116_vm1, %v4014_v49, %v451_v39 }
  0xe0   : > { %3356 = vmatpush3.bf16.msra.mxu0 %v3661_v38  ;;  %v612_v32 = vsel %vm5116_vm1, %v4032_v57, %v449_v40  ;;  %v3662_v40 = vld [vmem:[%s5099_s4 + $0x28] sm:$0xff]  }
  0xe1   : > { %3357 = vmatprep.subr.bf16.mxu0 %v3817_v27 }
  0xe2   : > { %v479_v42 = vpop.permute.xlu1 %478 }
  0xe3   : > { %v477_v43 = vpop.permute.xlu0 %476  ;;  %v627_v2 = vsel %vm5115_vm2, %v610_v0, %v479_v42  ;;  %v3663_v42 = vld [vmem:[%s5099_s4 + $0x78] sm:$0xff]  }
  0xe4   : > { %v625_v4 = vsel %vm5115_vm2, %v608_v1, %v477_v43  ;;  %3358 = vmatpush3.bf16.msra.mxu0 %v3662_v40  ;;  %3326 = vmatpush3.bf16.msra.mxu1 %v3663_v42  ;;  %v3664_v43 = vld [vmem:[%s5099_s4 + $0x20] sm:$0xff]  }
  0xe5   : > { %3359 = vmatprep.subr.bf16.mxu0 %v3817_v27  ;;  %3327 = vmatprep.subr.bf16.mxu1 %v3817_v27 }
  0xe6   : > { %v483_v44 = vpop.permute.xlu1 %482 }
  0xe7   : > { %v481_v45 = vpop.permute.xlu0 %480  ;;  %v631_v13 = vsel %vm5115_vm2, %v614_v10, %v483_v44  ;;  %v3665_v44 = vld [vmem:[%s5099_s4 + $0x70] sm:$0xff]  }
  0xe8   : > { %v629_v16 = vsel %vm5115_vm2, %v612_v32, %v481_v45  ;;  %3360 = vmatpush3.bf16.msra.mxu0 %v3664_v43  ;;  %v3666_v45 = vld [vmem:[%s5099_s4 + $0x18] sm:$0xff]   ;;  %3328 = vmatpush3.bf16.msra.mxu1 %v3665_v44 }
  0xe9   : > { %3361 = vmatprep.subr.bf16.mxu0 %v3817_v27  ;;  %3329 = vmatprep.subr.bf16.mxu1 %v3817_v27 }
  0xea   : > { %v496_v46 = vpop.permute.xlu1 %495 }
  0xeb   : > { %v494_v47 = vpop.permute.xlu0 %493  ;;  %v644_v11 = vsel %vm5114_vm3, %v627_v2, %v496_v46  ;;  %v3667_v46 = vld [vmem:[%s5099_s4 + $0x68] sm:$0xff]  }
  0xec   : > { %v642_v6 = vsel %vm5114_vm3, %v625_v4, %v494_v47  ;;  %3362 = vmatpush3.bf16.msra.mxu0 %v3666_v45  ;;  %v3668_v47 = vld [vmem:[%s5099_s4 + $0x10] sm:$0xff]   ;;  %3330 = vmatpush3.bf16.msra.mxu1 %v3667_v46 }
  0xed   : > { %3363 = vmatprep.subr.bf16.mxu0 %v3817_v27  ;;  %3331 = vmatprep.subr.bf16.mxu1 %v3817_v27 }
  0xee   : > { %v500_v48 = vpop.permute.xlu1 %499 }
  0xef   : > { %v498_v50 = vpop.permute.xlu0 %497  ;;  %v648_v17 = vsel %vm5114_vm3, %v631_v13, %v500_v48  ;;  %v3669_v48 = vld [vmem:[%s5099_s4 + $0x60] sm:$0xff]  }
  0xf0   : > { %v646_v20 = vsel %vm5114_vm3, %v629_v16, %v498_v50  ;;  %3364 = vmatpush3.bf16.msra.mxu0 %v3668_v47  ;;  %v3670_v50 = vld [vmem:[%s5099_s4 + $0x8] sm:$0xff]   ;;  %3332 = vmatpush3.bf16.msra.mxu1 %v3669_v48 }
  0xf1   : > { %3365 = vmatprep.subr.bf16.mxu0 %v3817_v27  ;;  %3333 = vmatprep.subr.bf16.mxu1 %v3817_v27 }
  0xf2   : > { %v519_v51 = vpop.permute.xlu1 %518 }
  0xf3   : > { %v517_v52 = vpop.permute.xlu0 %516  ;;  %v661_v9 = vsel %vm5113_vm4, %v644_v11, %v519_v51  ;;  %v3671_v51 = vld [vmem:[%s5099_s4 + $0x58] sm:$0xff]  }
  0xf4   : > { %v659_v41 = vsel %vm5113_vm4, %v642_v6, %v517_v52  ;;  %3366 = vmatpush3.bf16.msra.mxu0 %v3670_v50  ;;  %v3672_v52 = vld [vmem:[%s5099_s4] sm:$0xff]   ;;  %3334 = vmatpush3.bf16.msra.mxu1 %v3671_v51 }
  0xf5   : > { %3367 = vmatprep.subr.bf16.mxu0 %v3817_v27  ;;  %3335 = vmatprep.subr.bf16.mxu1 %v3817_v27 }
  0xf6   : > { %v523_v53 = vpop.permute.xlu1 %522 }
  0xf7   : > { %v521_v54 = vpop.permute.xlu0 %520  ;;  %v665_v21 = vsel %vm5113_vm4, %v648_v17, %v523_v53  ;;  %v3673_v53 = vld [vmem:[%s5099_s4 + $0x50] sm:$0xff]  }
  0xf8   : > { %v663_v24 = vsel %vm5113_vm4, %v646_v20, %v521_v54  ;;  %3368 = vmatpush3.bf16.msra.mxu0 %v3672_v52  ;;  %3336 = vmatpush3.bf16.msra.mxu1 %v3673_v53  ;;  %v3674_v54 = vld [vmem:[%s5099_s4 + $0x48] sm:$0xff]  }
  0xf9   : > { %3409 = vmatprep.subr.bf16.mxu0 %v3817_v27  ;;  %3337 = vmatprep.subr.bf16.mxu1 %v3817_v27 }
  0xfa   : > { %v536_v55 = vpop.permute.xlu1 %535 }
  0xfb   : > { %v534_v56 = vpop.permute.xlu0 %533  ;;  %v678_v12 = vsel %vm5112_vm5, %v661_v9, %v536_v55  ;;  %v3675_v55 = vld [vmem:[%s5099_s4 + $0x40] sm:$0xff]  }
  0xfc   : > { %v676_v14 = vsel %vm5112_vm5, %v659_v41, %v534_v56  ;;  %3338 = vmatpush3.bf16.msra.mxu1 %v3674_v54  ;;  %v4264_v56 = vstv %s3059_s24 }
  0xfd   : > { %3339 = vmatprep.subr.bf16.mxu1 %v3817_v27  ;;  %vm913_vm13 = vcmp.ge.s32.totalorder %v4264_v56, 0  ;;  %vm921_vm14 = vcmp.lt.s32.totalorder %v4264_v56, 8 }
  0xfe   : > { %v540_v58 = vpop.permute.xlu1 %539 }
  0xff   : > { %v538_v59 = vpop.permute.xlu0 %537  ;;  %v682_v25 = vsel %vm5112_vm5, %v665_v21, %v540_v58  ;;  %v907_v58 = vadd.s32 2, %v4264_v56 }
 0x100   : > { %v680_v28 = vsel %vm5112_vm5, %v663_v24, %v538_v59  ;;  %3340 = vmatpush3.bf16.msra.mxu1 %v3675_v55  ;;  %v4270_v59 = vld [vmem:[%s5098_s3] ss:$0 sm:$0xff]  ;;  %vm929_vm5 = vmand %vm913_vm13, %vm921_vm14  ;;  %vm1044_vm13 = vcmask 1044480  }
 0x101   : > { %3381 = vmatprep.subr.bf16.mxu1 %v3817_v27  ;;  %vm915_vm11 = vcmp.ge.s32.totalorder %v907_v58, 0  ;;  %vm923_vm12 = vcmp.lt.s32.totalorder %v907_v58, 8 }
 0x102   : > { %v553_v60 = vpop.permute.xlu1 %552 }
 0x103   : > { %v551_v61 = vpop.permute.xlu0 %550  ;;  %v695_v15 = vsel %vm5111_vm6, %v678_v12, %v553_v60 }
 0x104   : > { %v693_v18 = vsel %vm5111_vm6, %v676_v14, %v551_v61  ;;  %v4272_v61 = vstv %s345_s18 }
 0x106   : > { %v557_v62 = vpop.permute.xlu1 %556 }
 0x107   : > { %v555_v7 = vpop.permute.xlu0 %554  ;;  %v699_v29 = vsel %vm5111_vm6, %v682_v25, %v557_v62  ;;  %v908_v62 = vadd.s32 3, %v4264_v56 }
 0x108   : > { %v697_v31 = vsel %vm5111_vm6, %v680_v28, %v555_v7 }
 0x10a   : > { %v576_v63 = vpop.permute.xlu1 %575 }
 0x10b   : > { %v574_v8 = vpop.permute.xlu0 %573  ;;  %v712_v49 = vsel %vm5110_vm7, %v695_v15, %v576_v63 }
 0x10c   : > { %v710_v57 = vsel %vm5110_vm7, %v693_v18, %v574_v8  ;;  %v906_v8 = vadd.s32 1, %v4264_v56 }
 0x10e   : > { %v580_v5 = vpop.permute.xlu1 %579  ;;  %vm914_vm4 = vcmp.ge.s32.totalorder %v906_v8, 0  ;;  %vm922_vm3 = vcmp.lt.s32.totalorder %v906_v8, 8 }
 0x10f   : > { %v578_v3 = vpop.permute.xlu0 %577  ;;  %v716_v33 = vsel %vm5110_vm7, %v699_v29, %v580_v5 }
 0x110   : > { %v714_v35 = vsel %vm5110_vm7, %v697_v31, %v578_v3  ;;  %vm924_vm7 = vcmp.lt.s32.totalorder %v908_v62, 8 }
 0x112   : > { %v593_v19 = vpop.permute.xlu1 %592 }
 0x113   : > { %v729_v22 = vsel %vm5109_vm8, %v712_v49, %v593_v19  ;;  %v591_v23 = vpop.permute.xlu0 %590 }
 0x114   : > { %v727_v26 = vsel %vm5109_vm8, %v710_v57, %v591_v23 }
 0x115   : > { %v3048_v30 = vcombine.low %v727_v26, %v729_v22 }
 0x116   : > { %v597_v34 = vpop.permute.xlu1 %596 }
 0x117   : > { %v733_v36 = vsel %vm5109_vm8, %v716_v33, %v597_v34  ;;  %3321 = vmatprep.mubr.msk.bf16.mxu0 %vm5108_vm9, %v3048_v30  ;;  %v595_v37 = vpop.permute.xlu0 %594 }
 0x118   : > { %v731_v38 = vsel %vm5109_vm8, %v714_v35, %v595_v37  ;;  %vm916_vm8 = vcmp.ge.s32.totalorder %v908_v62, 0 }
 0x119   : > { %v3049_v39 = vcombine.low %v731_v38, %v733_v36 }
 0x11b   : > { %3322 = vmatmul.mubr.msk.bf16.gmra.mxu0 %vm5108_vm9, %v3049_v39  ;;  %vm931_vm9 = vmand %vm915_vm11, %vm923_vm12 }
 0x11c   : > { %3369 = vmatprep.mubr.msk.bf16.mxu0 %vm3818_vm10, %v3817_v27  ;;  %vm932_vm12 = vmand %vm916_vm8, %vm924_vm7  ;;  %vm1045_vm7 = vsmask.f32 4352  ;;  %vm1545_vm8 = vcmask 1046532  }
 0x19b   : > { %v3319_v60 = vpop.f32.mrf.mxu0 }
 0x19c   : > { %v857_v7 = vadd.f32 %v3319_v60, %v4270_v59 }
 0x19d   : > { %v848_v63 = vpop.f32.mrf.mxu0 }
 0x19e   : > { %vm881_vm15 = vcmp.ge.f32.partialorder %v857_v7, 0.0  ;;  %v890_v0 = vmul.f32 %v4272_v61, %v857_v7  ;;  %v849_v1 = vadd.f32 %v4270_v59, %v848_v63 }
 0x19f   : > { %v3320_v2 = vpop.f32.mrf.mxu0 }
 0x1a0   : > { %v898_v4 = vsel %vm881_vm15, %v857_v7, %v890_v0  ;;  %vm879_vm6 = vcmp.ge.f32.partialorder %v849_v1, 0.0  ;;  %v888_v11 = vmul.f32 %v4272_v61, %v849_v1  ;;  %v860_v5 = vadd.f32 %v3320_v2, %v4270_v59  ;;  %v3676_v0 = vld [vmem:[%s5099_s4 + $0xf8] sm:$0xff]  }
 0x1a1   : > { %v4283_v6 = vsel %vm931_vm9, %v898_v4, 0.0  ;;  %v851_v9 = vpop.f32.mrf.mxu0  ;;  %vm1033_vm15 = vcmask 1040384   ;;  %vm1034_vm9 = vsmask.f32 256 }
 0x1a2   : > { %v963_v3 = vpack.c.bf16 %v4283_v6, %v4283_v6  ;;  %v896_v10 = vsel %vm879_vm6, %v849_v1, %v888_v11  ;;  %vm882_vm11 = vcmp.ge.f32.partialorder %v860_v5, 0.0  ;;  %v891_v41 = vmul.f32 %v4272_v61, %v860_v5  ;;  %vm930_vm6 = vmand %vm914_vm4, %vm922_vm3 }
 0x1a3   : > { %v953_v12 = vsel %vm929_vm5, %v896_v10, 0.0  ;;  %v852_v32 = vadd.f32 %v4270_v59, %v851_v9  ;;  %vm4299_vm5 = vmand %vm1033_vm15, %vm1034_vm9  ;;  %vm1544_vm4 = vcmask 1042432  }
 0x1a4   : > { %v984_v13 = vshrl.u32 %v963_v3, 16  ;;  %v961_v14 = vpack.c.bf16 %v953_v12, %v953_v12  ;;  %v899_v15 = vsel %vm882_vm11, %v860_v5, %v891_v41  ;;  %v987_v20 = vshll.u32 %v963_v3, 16  ;;  %vm4304_vm3 = vmand %vm1044_vm13, %vm1045_vm7 }
 0x1a5   : > { %v4290_v16 = vsel %vm932_vm12, %v899_v15, 0.0  ;;  %vm880_vm14 = vcmp.ge.f32.partialorder %v852_v32, 0.0  ;;  %v889_v17 = vmul.f32 %v4272_v61, %v852_v32  ;;  %vm1229_vm11 = vsmask.f32 3328  ;;  %vm4375_vm15 = vmor %vm1544_vm4, %vm1545_vm8 }
 0x1a6   : > { %v986_v18 = vrot.slane %v984_v13, 7  ;;  %v970_v49 = vshrl.u32 %v961_v14, 16  ;;  %v964_v19 = vpack.c.bf16 %v4290_v16, %v4290_v16  ;;  %v973_v22 = vshll.u32 %v961_v14, 16 }
 0x1a7   : > { %v897_v21 = vsel %vm880_vm14, %v852_v32, %v889_v17  ;;  %vm1230_vm12 = vsmask.f32 7440 }
 0x1a8   : > { %v972_v57 = vrot.slane %v970_v49, 7  ;;  %v991_v24 = vshrl.u32 %v964_v19, 16  ;;  %v954_v25 = vsel %vm930_vm6, %v897_v21, 0.0  ;;  %v989_v29 = vor.u32 %v987_v20, %v986_v18  ;;  %v3677_v49 = vld [vmem:[%s5099_s4 + $0xf0] sm:$0xff]   ;;  %vm4381_vm9 = vmor %vm1229_vm11, %vm1230_vm12 }
 0x1a9   : > { %v962_v28 = vpack.c.bf16 %v954_v25, %v954_v25  ;;  %v994_v33 = vshll.u32 %v964_v19, 16 }
 0x1aa   : > { %v975_v30 = vor.u32 %v973_v22, %v972_v57  ;;  %v993_v31 = vrot.slane %v991_v24, 7  ;;  %v1038_v35 = vsel %vm4299_vm5, 0, %v989_v29  ;;  %v3705_v29 = vld [vmem:[%s5099_s4 + $0x110] sm:$0xff]  }
 0x1ab   : > { %v977_v34 = vshrl.u32 %v962_v28, 16  ;;  %v4314_v38 = vsel %vm4304_vm3, %v1038_v35, 0  ;;  %v980_v42 = vshll.u32 %v962_v28, 16 }
 0x1ac   : > { %v1036_v36 = vsel %vm4299_vm5, 0, %v975_v30  ;;  %v996_v37 = vor.u32 %v994_v33, %v993_v31  ;;  %v4320_v43 = vcombine.low %v4314_v38, %v4314_v38  ;;  %v4328_v46 = vcombine.high %v4314_v38, %v4314_v38  ;;  %v3727_v30 = vld [vmem:[%s5099_s4 + $0x220] sm:$0xff]  }
 0x1ad   : > { %v1047_v39 = vsel %vm4304_vm3, %v1036_v36, 0  ;;  %v979_v40 = vrot.slane %v977_v34, 7 }
 0x1ae   : > { %v4322_v44 = vcombine.low %v1047_v39, %v1047_v39  ;;  %v1039_v45 = vsel %vm4299_vm5, 0, %v996_v37  ;;  %v3061_v50 = vcombine.high %v1047_v39, %v1047_v39  ;;  %v1261_v51 = vshrl.u32 %v4320_v43, 16 }
 0x1af   : > { %v982_v47 = vor.u32 %v980_v42, %v979_v40  ;;  %v4332_v48 = vsel %vm4304_vm3, %v1039_v45, 0  ;;  %v1264_v55 = vshll.u32 %v4320_v43, 16  ;;  %v1270_v3 = vshll.u32 %v4328_v46, 16 }
 0x1b0   : > { %v4337_v52 = vcombine.low %v4332_v48, %v4332_v48  ;;  %v1233_v53 = vshrl.u32 %v4322_v44, 16  ;;  %v1236_v54 = vshll.u32 %v4322_v44, 16  ;;  %v4346_v60 = vcombine.low %v4314_v38, %v4332_v48 }
 0x1b1   : > { %v1037_v58 = vsel %vm4299_vm5, 0, %v982_v47  ;;  %v1263_v8 = vrot.slane %v1261_v51, 4  ;;  %v1242_v11 = vshll.u32 %v3061_v50, 16  ;;  %v1266_v9 = vrot.slane %v1264_v55, 5 }
 0x1b2   : > { %v4350_v62 = vsel %vm4304_vm3, %v1037_v58, 0  ;;  %v1235_v7 = vrot.slane %v1233_v53, 4  ;;  %v1238_v63 = vrot.slane %v1236_v54, 5  ;;  %v1275_v10 = vshrl.u32 %v4337_v52, 16 }
 0x1b3   : > { %v3083_v1 = vcombine.low %v1047_v39, %v4350_v62  ;;  %v3062_v2 = vcombine.low %v4350_v62, %v4350_v62  ;;  %v3063_v4 = vcombine.high %v4350_v62, %v4350_v62  ;;  %v1549_v32 = vrot.slane %v3061_v50, 5  ;;  %v3678_v39 = vld [vmem:[%s5099_s4 + $0xe8] sm:$0xff]  }
 0x1b4   : > { %v1239_v5 = vor.u32 %v1238_v63, %v1235_v7  ;;  %v3067_v13 = vcombine.high %v4332_v48, %v4332_v48  ;;  %v1267_v18 = vor.u32 %v1266_v9, %v1263_v8  ;;  %v1277_v21 = vrot.slane %v1275_v10, 4  ;;  %v3679_v7 = vld [vmem:[%s5099_s4 + $0xb8] sm:$0xff]   ;;  %v3683_v10 = vld [vmem:[%s5099_s4 + $0xa8] sm:$0xff]  }
 0x1b5   : > { %3370 = vmatmul.mubr.bf16.vlgmr.msra.gmra.mxu0 %v3083_v1  ;;  %v1247_v41 = vshrl.u32 %v3062_v2, 16  ;;  %v1250_v12 = vshll.u32 %v3062_v2, 16  ;;  %v1256_v15 = vshll.u32 %v3063_v4, 16  ;;  %v1553_v17 = vrot.slane %v3063_v4, 5  ;;  %v3682_v9 = vld [vmem:[%s5099_s4 + $0xd8] sm:$0xff]  }
 0x1b6   : > { %3373 = vmatprep.mubr.msk.bf16.mxu0 %vm3818_vm10, %v3817_v27  ;;  %v1240_v14 = vrot.slane %v1239_v5, 4  ;;  %3410 = vmatpush3.bf16.msra.mxu0 %v3676_v0  ;;  %v1278_v57 = vshll.u32 %v4337_v52, 16  ;;  %v1244_v22 = vrot.slane %v1242_v11, 5  ;;  %v1268_v24 = vrot.slane %v1267_v18, 4  ;;  %v3680_v0 = vld [vmem:[%s5099_s4 + $0xe0] sm:$0xff]   ;;  %v3681_v5 = vld [vmem:[%s5099_s4 + $0xb0] sm:$0xff]  }
 0x1b7   : > { %v1249_v19 = vrot.slane %v1247_v41, 4  ;;  %v1252_v20 = vrot.slane %v1250_v12, 5  ;;  %3411 = vmatprep.subr.bf16.mxu0 %v3817_v27  ;;  %v1272_v25 = vrot.slane %v1270_v3, 5  ;;  %v3111_v28 = vcombine.low %v4350_v62, %v4314_v38  ;;  %v3684_v12 = vld [vmem:[%s5099_s4 + $0xd0] sm:$0xff]   ;;  %v3691_v18 = vld [vmem:[%s5099_s4 + $0x88] sm:$0xff]  }
 0x1b8   : > { %v1280_v33 = vrot.slane %v1278_v57, 5  ;;  %v3094_v34 = vrot.slane %v4322_v44, 9  ;;  %v3095_v35 = vrot.slane %v3062_v2, 9  ;;  %v1245_v36 = vsel %vm4381_vm9, %v1240_v14, %v1244_v22  ;;  %v3687_v14 = vld [vmem:[%s5099_s4 + $0x98] sm:$0xff]   ;;  %v3692_v38 = vld [vmem:[%s5099_s4 + $0x170] sm:$0xff]  }
 0x1b9   : > { %v1253_v31 = vor.u32 %v1252_v20, %v1249_v19  ;;  %v1258_v37 = vrot.slane %v1256_v15, 5  ;;  %v3096_v40 = vrot.slane %v4320_v43, 9  ;;  %v1557_v42 = vrot.slane %v4328_v46, 5  ;;  %v3688_v15 = vld [vmem:[%s5099_s4 + $0xc0] sm:$0xff]  }
 0x1ba   : > { %3412 = vmatpush3.bf16.msra.mxu0 %v3677_v49  ;;  %v1281_v47 = vor.u32 %v1280_v33, %v1277_v21  ;;  %v4396_v44 = vsel %vm4375_vm15, %v3094_v34, %v1549_v32  ;;  %v4400_v50 = vsel %vm4375_vm15, %v3095_v35, %v1553_v17  ;;  %v3097_v46 = vrot.slane %v4337_v52, 9  ;;  %v3685_v32 = vld [vmem:[%s5099_s4 + $0xa0] sm:$0xff]   ;;  %v3689_v17 = vld [vmem:[%s5099_s4 + $0x90] sm:$0xff]  }
 0x1bb   : > { %v1254_v45 = vrot.slane %v1253_v31, 4  ;;  %3413 = vmatprep.subr.bf16.mxu0 %v3817_v27  ;;  %v3100_v51 = vcombine.low %v4396_v44, %v4400_v50  ;;  %v4406_v43 = vsel %vm4375_vm15, %v3096_v40, %v1557_v42  ;;  %v1561_v53 = vrot.slane %v3067_v13, 5  ;;  %v3693_v20 = vld [vmem:[%s5099_s4 + $0x80] sm:$0xff]  }
 0x1bc   : > { %v4416_v55 = vsel %vm4381_vm9, %v1268_v24, %v1272_v25  ;;  %v1284_v58 = vshll.u32 %v3067_v13, 16  ;;  %v3136_v63 = vcombine.low %v4400_v50, %v4406_v43  ;;  %v1282_v2 = vrot.slane %v1281_v47, 4  ;;  %v3686_v13 = vld [vmem:[%s5099_s4 + $0xc8] sm:$0xff]   ;;  %v3709_v50 = vld [vmem:[%s5099_s4 + $0x100] sm:$0xff]  }
 0x1bd   : > { %3374 = vmatmul.mubr.bf16.gmra.mxu0 %v4346_v60  ;;  %v4412_v54 = vsel %vm4381_vm9, %v1254_v45, %v1258_v37  ;;  %v4433_v1 = vsel %vm4375_vm15, %v3097_v46, %v1561_v53  ;;  %v911_v49 = vadd.s32 6, %v4264_v56  ;;  %v909_v19 = vadd.s32 4, %v4264_v56 }
 0x1be   : > { %v3072_v52 = vcombine.low %v1245_v36, %v4412_v54  ;;  %v3124_v8 = vcombine.low %v4412_v54, %v4416_v55  ;;  %3414 = vmatpush3.bf16.msra.mxu0 %v3678_v39  ;;  %3377 = vmatprep.mubr.msk.bf16.mxu0 %vm3818_vm10, %v3817_v27  ;;  %v4438_v4 = vcombine.low %v4406_v43, %v4433_v1  ;;  %v1286_v11 = vrot.slane %v1284_v58, 5  ;;  %v3710_v43 = vld [vmem:[%s5099_s4 + $0x1e8] sm:$0xff]  }
 0x1bf   : > { %3415 = vmatprep.subr.bf16.mxu0 %v3817_v27  ;;  %vm919_vm13 = vcmp.ge.s32.totalorder %v911_v49, 0  ;;  %vm927_vm14 = vcmp.lt.s32.totalorder %v911_v49, 8  ;;  %v912_v57 = vadd.s32 7, %v4264_v56  ;;  %vm917_vm6 = vcmp.ge.s32.totalorder %v909_v19, 0 }
 0x1c0   : > { %3342 = vmatmul.mubr.bf16.vlgmr.msra.gmra.mxu1 %v3072_v52  ;;  %v4451_v3 = vsel %vm4381_vm9, %v1282_v2, %v1286_v11  ;;  %vm925_vm7 = vcmp.lt.s32.totalorder %v909_v19, 8  ;;  %vm935_vm8 = vmand %vm919_vm13, %vm927_vm14  ;;  %v910_v34 = vadd.s32 5, %v4264_v56 }
 0x1c1   : > { %3345 = vmatprep.mubr.msk.bf16.mxu1 %vm3818_vm10, %v3817_v27  ;;  %3382 = vmatpush3.bf16.msra.mxu1 %v3679_v7  ;;  %v4459_v41 = vcombine.low %v4416_v55, %v4451_v3  ;;  %vm920_vm11 = vcmp.ge.s32.totalorder %v912_v57, 0  ;;  %vm928_vm12 = vcmp.lt.s32.totalorder %v912_v57, 8  ;;  %vm933_vm1 = vmand %vm917_vm6, %vm925_vm7  ;;  %v3715_v55 = vld [vmem:[%s5099_s4 + $0x1a8] sm:$0xff]  }
 0x1c2   : > { %3416 = vmatpush3.bf16.msra.mxu0 %v3680_v0  ;;  %3383 = vmatprep.subr.bf16.mxu1 %v3817_v27  ;;  %vm936_vm14 = vmand %vm920_vm11, %vm928_vm12  ;;  %vm926_vm0 = vcmp.lt.s32.totalorder %v910_v34, 8 }
 0x1c3   : > { %3417 = vmatprep.subr.bf16.mxu0 %v3817_v27 }
 0x1c5   : > { %3384 = vmatpush3.bf16.msra.mxu1 %v3681_v5 }
 0x1c6   : > { %3418 = vmatpush3.bf16.msra.mxu0 %v3682_v9  ;;  %3385 = vmatprep.subr.bf16.mxu1 %v3817_v27 }
 0x1c7   : > { %3419 = vmatprep.subr.bf16.mxu0 %v3817_v27 }
 0x1c8   : > { %3346 = vmatmul.mubr.bf16.gmra.mxu1 %v4459_v41 }
 0x1c9   : > { %3386 = vmatpush3.bf16.msra.mxu1 %v3683_v10  ;;  %3349 = vmatprep.mubr.msk.bf16.mxu1 %vm3818_vm10, %v3817_v27 }
 0x1ca   : > { %3420 = vmatpush3.bf16.msra.mxu0 %v3684_v12  ;;  %3387 = vmatprep.subr.bf16.mxu1 %v3817_v27 }
 0x1cb   : > { %3421 = vmatprep.subr.bf16.mxu0 %v3817_v27 }
 0x1cd   : > { %3388 = vmatpush3.bf16.msra.mxu1 %v3685_v32 }
 0x1ce   : > { %3422 = vmatpush3.bf16.msra.mxu0 %v3686_v13  ;;  %3389 = vmatprep.subr.bf16.mxu1 %v3817_v27 }
 0x1cf   : > { %3423 = vmatprep.subr.bf16.mxu0 %v3817_v27 }
 0x1d1   : > { %3390 = vmatpush3.bf16.msra.mxu1 %v3687_v14 }
 0x1d2   : > { %3424 = vmatpush3.bf16.msra.mxu0 %v3688_v15  ;;  %3391 = vmatprep.subr.bf16.mxu1 %v3817_v27 }
 0x1d3   : > { %3465 = vmatprep.subr.bf16.mxu0 %v3817_v27 }
 0x1d5   : > { %3392 = vmatpush3.bf16.msra.mxu1 %v3689_v17 }
 0x1d6   : > { %3393 = vmatprep.subr.bf16.mxu1 %v3817_v27 }
 0x1d9   : > { %3394 = vmatpush3.bf16.msra.mxu1 %v3691_v18 }
 0x1da   : > { %3395 = vmatprep.subr.bf16.mxu1 %v3817_v27 }
 0x1db   : > { %v3323_v21 = vpop.f32.mrf.mxu0 }
 0x1dc   : > { %v873_v22 = vadd.f32 %v3323_v21, %v4270_v59 }
 0x1dd   : > { %v864_v24 = vpop.f32.mrf.mxu0  ;;  %3396 = vmatpush3.bf16.msra.mxu1 %v3693_v20 }
 0x1de   : > { %vm885_vm4 = vcmp.ge.f32.partialorder %v873_v22, 0.0  ;;  %v894_v25 = vmul.f32 %v4272_v61, %v873_v22  ;;  %v865_v31 = vadd.f32 %v4270_v59, %v864_v24  ;;  %3437 = vmatprep.subr.bf16.mxu1 %v3817_v27 }
 0x1df   : > { %v3324_v33 = vpop.f32.mrf.mxu0 }
 0x1e0   : > { %v902_v35 = vsel %vm885_vm4, %v873_v22, %v894_v25  ;;  %vm883_vm2 = vcmp.ge.f32.partialorder %v865_v31, 0.0  ;;  %v892_v36 = vmul.f32 %v4272_v61, %v865_v31  ;;  %v876_v37 = vadd.f32 %v3324_v33, %v4270_v59 }
 0x1e1   : > { %v959_v39 = vsel %vm935_vm8, %v902_v35, 0.0  ;;  %v867_v40 = vpop.f32.mrf.mxu0  ;;  %vm918_vm4 = vcmp.ge.s32.totalorder %v910_v34, 0 }
 0x1e2   : > { %v967_v42 = vpack.c.bf16 %v959_v39, %v959_v39  ;;  %v900_v45 = vsel %vm883_vm2, %v865_v31, %v892_v36  ;;  %vm886_vm13 = vcmp.ge.f32.partialorder %v876_v37, 0.0  ;;  %v895_v47 = vmul.f32 %v4272_v61, %v876_v37  ;;  %vm934_vm2 = vmand %vm918_vm4, %vm926_vm0 }
 0x1e3   : > { %v4510_v46 = vsel %vm933_vm1, %v900_v45, 0.0  ;;  %v868_v56 = vadd.f32 %v4270_v59, %v867_v40  ;;  %vm2478_vm0 = vcmask 1046528  }
 0x1e4   : > { %v965_v53 = vpack.c.bf16 %v4510_v46, %v4510_v46  ;;  %v903_v58 = vsel %vm886_vm13, %v876_v37, %v895_v47  ;;  %v1012_v7 = vshrl.u32 %v967_v42, 16  ;;  %v1015_v17 = vshll.u32 %v967_v42, 16 }
 0x1e5   : > { %v960_v52 = vsel %vm936_vm14, %v903_v58, 0.0  ;;  %vm884_vm6 = vcmp.ge.f32.partialorder %v868_v56, 0.0  ;;  %v893_v0 = vmul.f32 %v4272_v61, %v868_v56 }
 0x1e6   : > { %v998_v2 = vshrl.u32 %v965_v53, 16  ;;  %v968_v11 = vpack.c.bf16 %v960_v52, %v960_v52  ;;  %v1001_v10 = vshll.u32 %v965_v53, 16  ;;  %v1014_v32 = vrot.slane %v1012_v7, 7 }
 0x1e7   : > { %v901_v5 = vsel %vm884_vm6, %v868_v56, %v893_v0 }
 0x1e8   : > { %v1000_v9 = vrot.slane %v998_v2, 7  ;;  %v1019_v12 = vshrl.u32 %v968_v11, 16  ;;  %v4516_v59 = vsel %vm934_vm2, %v901_v5, 0.0  ;;  %v1022_v18 = vshll.u32 %v968_v11, 16 }
 0x1e9   : > { %v966_v14 = vpack.c.bf16 %v4516_v59, %v4516_v59  ;;  %v1017_v19 = vor.u32 %v1015_v17, %v1014_v32  ;;  %v3690_v17 = vld [vmem:[%s5099_s4 + $0x178] sm:$0xff]  }
 0x1ea   : > { %v1021_v13 = vrot.slane %v1019_v12, 7  ;;  %v1003_v15 = vor.u32 %v1001_v10, %v1000_v9 }
 0x1eb   : > { %v1005_v49 = vshrl.u32 %v966_v14, 16  ;;  %v1008_v22 = vshll.u32 %v966_v14, 16  ;;  %v1042_v34 = vsel %vm4299_vm5, 0, %v1017_v19 }
 0x1ec   : > { %v1040_v61 = vsel %vm4299_vm5, 0, %v1003_v15  ;;  %v1024_v21 = vor.u32 %v1022_v18, %v1021_v13  ;;  %v4553_v53 = vsel %vm4304_vm3, %v1042_v34, 0 }
 0x1ed   : > { %v1051_v20 = vsel %vm4304_vm3, %v1040_v61, 0  ;;  %v1007_v57 = vrot.slane %v1005_v49, 7  ;;  %v4567_v11 = vcombine.low %v4553_v53, %v4553_v53  ;;  %v4571_v5 = vcombine.high %v4553_v53, %v4553_v53 }
 0x1ee   : > { %v4524_v24 = vcombine.low %v1051_v20, %v1051_v20  ;;  %v1043_v35 = vsel %vm4299_vm5, 0, %v1024_v21  ;;  %v4538_v42 = vcombine.high %v1051_v20, %v1051_v20 }
 0x1ef   : > { %v1010_v25 = vor.u32 %v1008_v22, %v1007_v57  ;;  %v4557_v58 = vsel %vm4304_vm3, %v1043_v35, 0  ;;  %v3135_v49 = vrot.slane %v4567_v11, 9  ;;  %v1950_v61 = vrot.slane %v4571_v5, 5 }
 0x1f0   : > { %v1289_v31 = vshrl.u32 %v4524_v24, 16  ;;  %v1292_v33 = vshll.u32 %v4524_v24, 16  ;;  %v1298_v2 = vshll.u32 %v4538_v42, 16  ;;  %v4575_v9 = vcombine.low %v4557_v58, %v4557_v58 }
 0x1f1   : > { %v1041_v36 = vsel %vm4299_vm5, 0, %v1010_v25  ;;  %v4580_v15 = vcombine.high %v4557_v58, %v4557_v58  ;;  %v3147_v19 = vcombine.low %v4553_v53, %v4557_v58  ;;  %v4617_v62 = vsel %vm4375_vm15, %v3135_v49, %v1950_v61  ;;  %v3711_v49 = vld [vmem:[%s5099_s4 + $0x1b8] sm:$0xff]  }
 0x1f2   : > { %v1291_v37 = vrot.slane %v1289_v31, 4  ;;  %v1294_v39 = vrot.slane %v1292_v33, 5  ;;  %v4536_v40 = vsel %vm4304_vm3, %v1041_v36, 0  ;;  %v1300_v18 = vrot.slane %v1298_v2, 5  ;;  %v3694_v36 = vld [vmem:[%s5099_s4 + $0x168] sm:$0xff]  }
 0x1f3   : > { %v4542_v45 = vcombine.low %v4536_v40, %v4536_v40  ;;  %v4545_v47 = vcombine.low %v1051_v20, %v4536_v40  ;;  %v4549_v56 = vcombine.high %v4536_v40, %v4536_v40  ;;  %v3167_v22 = vrot.slane %v4575_v9, 9 }
 0x1f4   : > { %v1295_v7 = vor.u32 %v1294_v39, %v1291_v37  ;;  %v2318_v25 = vrot.slane %v4580_v15, 5  ;;  %v3112_v37 = vcombine.low %v4332_v48, %v1051_v20  ;;  %v3695_v39 = vld [vmem:[%s5099_s4 + $0x138] sm:$0xff]   ;;  %v3697_v48 = vld [vmem:[%s5099_s4 + $0x130] sm:$0xff]   ;;  %v3113_v44 = vcombine.low %v4536_v40, %v4553_v53  ;;  %v3701_v40 = vld [vmem:[%s5099_s4 + $0x120] sm:$0xff]  }
 0x1f5   : > { %3378 = vmatmul.mubr.bf16.gmra.mxu0 %v4545_v47  ;;  %v1303_v52 = vshrl.u32 %v4542_v45, 16  ;;  %v1306_v0 = vshll.u32 %v4542_v45, 16  ;;  %v1312_v32 = vshll.u32 %v4549_v56, 16  ;;  %v3698_v20 = vld [vmem:[%s5099_s4 + $0x158] sm:$0xff]   ;;  %v1569_v2 = vrot.slane %v4549_v56, 5  ;;  %v3731_v53 = vld [vmem:[%s5099_s4 + $0x200] sm:$0xff]  }
 0x1f6   : > { %3425 = vmatprep.mubr.msk.bf16.mxu0 %vm3818_vm10, %v3817_v27  ;;  %v1296_v13 = vrot.slane %v1295_v7, 4  ;;  %v4604_v34 = vsel %vm4375_vm15, %v3167_v22, %v2318_v25  ;;  %v3696_v7 = vld [vmem:[%s5099_s4 + $0x160] sm:$0xff]   ;;  %v1817_v61 = vshrl.u32 %v4567_v11, 16  ;;  %v3714_v25 = vld [vmem:[%s5099_s4 + $0x1d8] sm:$0xff]  }
 0x1f7   : > { %v1305_v10 = vrot.slane %v1303_v52, 4  ;;  %v1308_v12 = vrot.slane %v1306_v0, 5  ;;  %v1314_v57 = vrot.slane %v1312_v32, 5  ;;  %v3700_v52 = vld [vmem:[%s5099_s4 + $0x150] sm:$0xff]   ;;  %v3099_v0 = vrot.slane %v4542_v45, 9  ;;  %v3702_v45 = vld [vmem:[%s5099_s4 + $0x148] sm:$0xff]  }
 0x1f8   : > { %v4596_v31 = vsel %vm4381_vm9, %v1296_v13, %v1300_v18  ;;  %v3704_v13 = vld [vmem:[%s5099_s4 + $0x140] sm:$0xff]   ;;  %v3708_v18 = vld [vmem:[%s5099_s4 + $0x1f0] sm:$0xff]  }
 0x1f9   : > { %v1309_v14 = vor.u32 %v1308_v12, %v1305_v10  ;;  %v3098_v10 = vrot.slane %v4524_v24, 9  ;;  %v1565_v12 = vrot.slane %v4538_v42, 5  ;;  %v1570_v56 = vsel %vm4375_vm15, %v3099_v0, %v1569_v2  ;;  %v3703_v24 = vld [vmem:[%s5099_s4 + $0x118] sm:$0xff]   ;;  %v3721_v0 = vld [vmem:[%s5099_s4 + $0x190] sm:$0xff]  }
 0x1fa   : > { %v3138_v54 = vcombine.low %v1570_v56, %v4617_v62 }
 0x1fb   : > { %v1310_v21 = vrot.slane %v1309_v14, 4  ;;  %v1566_v32 = vsel %vm4375_vm15, %v3098_v10, %v1565_v12  ;;  %v3706_v14 = vld [vmem:[%s5099_s4 + $0x1f8] sm:$0xff]   ;;  %v3723_v10 = vld [vmem:[%s5099_s4 + $0x180] sm:$0xff]   ;;  %v2198_v12 = vshll.u32 %v4580_v15, 16  ;;  %v3725_v15 = vld [vmem:[%s5099_s4 + $0x230] sm:$0xff]  }
 0x1fc   : > { %v4687_v42 = vcombine.low %v1566_v32, %v1570_v56 }
 0x1fd   : > { %3426 = vmatmul.mubr.bf16.vlgmr.msra.gmra.mxu0 %v3111_v28  ;;  %v4600_v33 = vsel %vm4381_vm9, %v1310_v21, %v1314_v57  ;;  %v3168_v28 = vcombine.low %v4617_v62, %v4604_v34  ;;  %v1820_v21 = vshll.u32 %v4567_v11, 16  ;;  %v3712_v57 = vld [vmem:[%s5099_s4 + $0x1e0] sm:$0xff]   ;;  %v1819_v11 = vrot.slane %v1817_v61, 4 }
 0x1fe   : > { %3466 = vmatpush3.bf16.msra.mxu0 %v3690_v17  ;;  %v4608_v35 = vcombine.low %v4596_v31, %v4600_v33  ;;  %3429 = vmatprep.mubr.msk.bf16.mxu0 %vm3818_vm10, %v3817_v27  ;;  %v3707_v17 = vld [vmem:[%s5099_s4 + $0x108] sm:$0xff]   ;;  %v2200_v56 = vrot.slane %v2198_v12, 5 }
 0x1ff   : > { %3467 = vmatprep.subr.bf16.mxu0 %v3817_v27  ;;  %v1822_v22 = vrot.slane %v1820_v21, 5 }
 0x200   : > { %3350 = vmatmul.mubr.bf16.gmra.mxu1 %v4608_v35 }
 0x201   : > { %3397 = vmatprep.mubr.msk.bf16.mxu1 %vm3818_vm10, %v3817_v27 }
 0x202   : > { %3468 = vmatpush3.bf16.msra.mxu0 %v3692_v38  ;;  %v3125_v38 = vcombine.low %v4451_v3, %v4596_v31 }
 0x203   : > { %3469 = vmatprep.subr.bf16.mxu0 %v3817_v27 }
 0x205   : > { %3430 = vmatmul.mubr.bf16.gmra.mxu0 %v3112_v37  ;;  %v1826_v37 = vshll.u32 %v4571_v5, 16  ;;  %v3718_v5 = vld [vmem:[%s5099_s4 + $0x1c8] sm:$0xff]  }
 0x206   : > { %3470 = vmatpush3.bf16.msra.mxu0 %v3694_v36  ;;  %3433 = vmatprep.mubr.msk.bf16.mxu0 %vm3818_vm10, %v3817_v27  ;;  %v3716_v36 = vld [vmem:[%s5099_s4 + $0x1d0] sm:$0xff]  }
 0x207   : > { %3471 = vmatprep.subr.bf16.mxu0 %v3817_v27  ;;  %v1828_v31 = vrot.slane %v1826_v37, 5 }
 0x208   : > { %3398 = vmatmul.mubr.bf16.vlgmr.msra.gmra.mxu1 %v3100_v51  ;;  %v3699_v51 = vld [vmem:[%s5099_s4 + $0x128] sm:$0xff]  }
 0x209   : > { %3438 = vmatpush3.bf16.msra.mxu1 %v3695_v39  ;;  %3401 = vmatprep.mubr.msk.bf16.mxu1 %vm3818_vm10, %v3817_v27  ;;  %v3717_v39 = vld [vmem:[%s5099_s4 + $0x1a0] sm:$0xff]  }
 0x20a   : > { %3472 = vmatpush3.bf16.msra.mxu0 %v3696_v7  ;;  %3439 = vmatprep.subr.bf16.mxu1 %v3817_v27 }
 0x20b   : > { %3473 = vmatprep.subr.bf16.mxu0 %v3817_v27 }
 0x20d   : > { %3440 = vmatpush3.bf16.msra.mxu1 %v3697_v48  ;;  %3434 = vmatmul.mubr.bf16.gmra.mxu0 %v3113_v44  ;;  %v3719_v48 = vld [vmem:[%s5099_s4 + $0x198] sm:$0xff]   ;;  %v3720_v44 = vld [vmem:[%s5099_s4 + $0x1c0] sm:$0xff]  }
 0x20e   : > { %3474 = vmatpush3.bf16.msra.mxu0 %v3698_v20  ;;  %3441 = vmatprep.subr.bf16.mxu1 %v3817_v27 }
 0x20f   : > { %3475 = vmatprep.subr.bf16.mxu0 %v3817_v27  ;;  %3481 = vmatprep.mubr.msk.bf16.mxu0 %vm3818_vm10, %v3817_v27 }
 0x210   : > { %3402 = vmatmul.mubr.bf16.gmra.mxu1 %v4438_v4 }
 0x211   : > { %3442 = vmatpush3.bf16.msra.mxu1 %v3699_v51  ;;  %3405 = vmatprep.mubr.msk.bf16.mxu1 %vm3818_vm10, %v3817_v27  ;;  %v2189_v51 = vshrl.u32 %v4575_v9, 16 }
 0x212   : > { %3476 = vmatpush3.bf16.msra.mxu0 %v3700_v52  ;;  %3443 = vmatprep.subr.bf16.mxu1 %v3817_v27  ;;  %v2192_v52 = vshll.u32 %v4575_v9, 16  ;;  %v3722_v9 = vld [vmem:[%s5099_s4 + $0x188] sm:$0xff]  }
 0x213   : > { %3477 = vmatprep.subr.bf16.mxu0 %v3817_v27 }
 0x214   : > { %v2194_v2 = vrot.slane %v2192_v52, 5 }
 0x215   : > { %3444 = vmatpush3.bf16.msra.mxu1 %v3701_v40 }
 0x216   : > { %3478 = vmatpush3.bf16.msra.mxu0 %v3702_v45  ;;  %3445 = vmatprep.subr.bf16.mxu1 %v3817_v27  ;;  %v3724_v45 = vld [vmem:[%s5099_s4 + $0x238] sm:$0xff]  }
 0x217   : > { %3479 = vmatprep.subr.bf16.mxu0 %v3817_v27 }
 0x218   : > { %3406 = vmatmul.mubr.bf16.gmra.mxu1 %v4687_v42 }
 0x219   : > { %3446 = vmatpush3.bf16.msra.mxu1 %v3703_v24  ;;  %3453 = vmatprep.mubr.msk.bf16.mxu1 %vm3818_vm10, %v3817_v27  ;;  %v3728_v24 = vld [vmem:[%s5099_s4 + $0x218] sm:$0xff]  }
 0x21a   : > { %3480 = vmatpush3.bf16.msra.mxu0 %v3704_v13  ;;  %3447 = vmatprep.subr.bf16.mxu1 %v3817_v27  ;;  %v3730_v13 = vld [vmem:[%s5099_s4 + $0x208] sm:$0xff]  }
 0x21b   : > { %3521 = vmatprep.subr.bf16.mxu0 %v3817_v27 }
 0x21d   : > { %3448 = vmatpush3.bf16.msra.mxu1 %v3705_v29  ;;  %3482 = vmatmul.mubr.bf16.vlgmr.msra.gmra.mxu0 %v3136_v63  ;;  %v3137_v63 = vcombine.low %v4433_v1, %v1566_v32  ;;  %v3713_v1 = vld [vmem:[%s5099_s4 + $0x1b0] sm:$0xff]  }
 0x21e   : > { %3522 = vmatpush3.bf16.msra.mxu0 %v3706_v14  ;;  %3449 = vmatprep.subr.bf16.mxu1 %v3817_v27 }
 0x21f   : > { %3523 = vmatprep.subr.bf16.mxu0 %v3817_v27  ;;  %3485 = vmatprep.mubr.msk.bf16.mxu0 %vm3818_vm10, %v3817_v27 }
 0x221   : > { %3450 = vmatpush3.bf16.msra.mxu1 %v3707_v17 }
 0x222   : > { %3524 = vmatpush3.bf16.msra.mxu0 %v3708_v18  ;;  %3451 = vmatprep.subr.bf16.mxu1 %v3817_v27 }
 0x223   : > { %3525 = vmatprep.subr.bf16.mxu0 %v3817_v27 }
 0x225   : > { %3452 = vmatpush3.bf16.msra.mxu1 %v3709_v50  ;;  %3486 = vmatmul.mubr.bf16.gmra.mxu0 %v3137_v63 }
 0x226   : > { %3526 = vmatpush3.bf16.msra.mxu0 %v3710_v43  ;;  %3493 = vmatprep.subr.bf16.mxu1 %v3817_v27 }
 0x227   : > { %3527 = vmatprep.subr.bf16.mxu0 %v3817_v27  ;;  %3489 = vmatprep.mubr.msk.bf16.mxu0 %vm3818_vm10, %v3817_v27 }
 0x228   : > { %3454 = vmatmul.mubr.bf16.vlgmr.msra.gmra.mxu1 %v3124_v8  ;;  %v1823_v8 = vor.u32 %v1822_v22, %v1819_v11 }
 0x229   : > { %3494 = vmatpush3.bf16.msra.mxu1 %v3711_v49  ;;  %3457 = vmatprep.mubr.msk.bf16.mxu1 %vm3818_vm10, %v3817_v27 }
 0x22a   : > { %3528 = vmatpush3.bf16.msra.mxu0 %v3712_v57  ;;  %3495 = vmatprep.subr.bf16.mxu1 %v3817_v27  ;;  %v1824_v3 = vrot.slane %v1823_v8, 4 }
 0x22b   : > { %3529 = vmatprep.subr.bf16.mxu0 %v3817_v27 }
 0x22c   : > { %v1829_v7 = vsel %vm4381_vm9, %v1824_v3, %v1828_v31 }
 0x22d   : > { %3490 = vmatmul.mubr.bf16.gmra.mxu0 %v3138_v54  ;;  %3496 = vmatpush3.bf16.msra.mxu1 %v3713_v1  ;;  %v3126_v20 = vcombine.low %v4600_v33, %v1829_v7  ;;  %v2191_v33 = vrot.slane %v2189_v51, 4 }
 0x22e   : > { %3530 = vmatpush3.bf16.msra.mxu0 %v3714_v25  ;;  %3497 = vmatprep.subr.bf16.mxu1 %v3817_v27 }
 0x22f   : > { %3531 = vmatprep.subr.bf16.mxu0 %v3817_v27  ;;  %3537 = vmatprep.mubr.msk.bf16.mxu0 %vm3818_vm10, %v3817_v27  ;;  %v2195_v40 = vor.u32 %v2194_v2, %v2191_v33 }
 0x230   : > { %3458 = vmatmul.mubr.bf16.gmra.mxu1 %v3125_v38 }
 0x231   : > { %3498 = vmatpush3.bf16.msra.mxu1 %v3715_v55  ;;  %3461 = vmatprep.mubr.msk.bf16.mxu1 %vm3818_vm10, %v3817_v27 }
 0x232   : > { %3532 = vmatpush3.bf16.msra.mxu0 %v3716_v36  ;;  %3499 = vmatprep.subr.bf16.mxu1 %v3817_v27 }
 0x233   : > { %3533 = vmatprep.subr.bf16.mxu0 %v3817_v27 }
 0x235   : > { %3500 = vmatpush3.bf16.msra.mxu1 %v3717_v39 }
 0x236   : > { %3534 = vmatpush3.bf16.msra.mxu0 %v3718_v5  ;;  %3501 = vmatprep.subr.bf16.mxu1 %v3817_v27 }
 0x237   : > { %3535 = vmatprep.subr.bf16.mxu0 %v3817_v27 }
 0x238   : > { %3462 = vmatmul.mubr.bf16.gmra.mxu1 %v3126_v20 }
 0x239   : > { %3502 = vmatpush3.bf16.msra.mxu1 %v3719_v48  ;;  %3509 = vmatprep.mubr.msk.bf16.mxu1 %vm3818_vm10, %v3817_v27 }
 0x23a   : > { %3536 = vmatpush3.bf16.msra.mxu0 %v3720_v44  ;;  %3503 = vmatprep.subr.bf16.mxu1 %v3817_v27 }
 0x23d   : > { %3504 = vmatpush3.bf16.msra.mxu1 %v3721_v0  ;;  %3538 = vmatmul.mubr.bf16.vlgmr.msra.gmra.mxu0 %v4459_v41  ;;  %v2196_v41 = vrot.slane %v2195_v40, 4 }
 0x23e   : > { %3505 = vmatprep.subr.bf16.mxu1 %v3817_v27  ;;  %3541 = vmatprep.mubr.msk.bf16.mxu0 %vm3818_vm10, %v3817_v27 }
 0x23f   : > { %v2201_v32 = vsel %vm4381_vm9, %v2196_v41, %v2200_v56 }
 0x241   : > { %3506 = vmatpush3.bf16.msra.mxu1 %v3722_v9 }
 0x242   : > { %3507 = vmatprep.subr.bf16.mxu1 %v3817_v27 }
 0x245   : > { %3508 = vmatpush3.bf16.msra.mxu1 %v3723_v10  ;;  %3542 = vmatmul.mubr.bf16.gmra.mxu0 %v4608_v35  ;;  %v3158_v35 = vcombine.low %v1829_v7, %v2201_v32 }
 0x246   : > { %3549 = vmatprep.subr.bf16.mxu1 %v3817_v27  ;;  %3545 = vmatprep.mubr.msk.bf16.mxu0 %vm3818_vm10, %v3817_v27 }
 0x248   : > { %3510 = vmatmul.mubr.bf16.vlgmr.msra.gmra.mxu1 %v4346_v60  ;;  %v3726_v60 = vld [vmem:[%s5099_s4 + $0x228] sm:$0xff]  }
 0x249   : > { %3550 = vmatpush3.bf16.msra.mxu1 %v3724_v45  ;;  %3513 = vmatprep.mubr.msk.bf16.mxu1 %vm3818_vm10, %v3817_v27 }
 0x24a   : > { %3551 = vmatprep.subr.bf16.mxu1 %v3817_v27 }
 0x24d   : > { %3546 = vmatmul.mubr.bf16.gmra.mxu0 %v3158_v35  ;;  %3552 = vmatpush3.bf16.msra.mxu1 %v3725_v15 }
 0x24e   : > { %3553 = vmatprep.subr.bf16.mxu1 %v3817_v27 }
 0x250   : > { %3514 = vmatmul.mubr.bf16.gmra.mxu1 %v4545_v47  ;;  %v3729_v47 = vld [vmem:[%s5099_s4 + $0x210] sm:$0xff]  }
 0x251   : > { %3554 = vmatpush3.bf16.msra.mxu1 %v3726_v60  ;;  %3517 = vmatprep.mubr.msk.bf16.mxu1 %vm3818_vm10, %v3817_v27 }
 0x252   : > { %3555 = vmatprep.subr.bf16.mxu1 %v3817_v27 }
 0x255   : > { %3556 = vmatpush3.bf16.msra.mxu1 %v3727_v30 }
 0x256   : > { %3557 = vmatprep.subr.bf16.mxu1 %v3817_v27 }
 0x258   : > { %3518 = vmatmul.mubr.bf16.gmra.mxu1 %v3147_v19 }
 0x259   : > { %3558 = vmatpush3.bf16.msra.mxu1 %v3728_v24  ;;  %3565 = vmatprep.mubr.msk.bf16.mxu1 %vm3818_vm10, %v3817_v27 }
 0x25a   : > { %3559 = vmatprep.subr.bf16.mxu1 %v3817_v27 }
 0x25d   : > { %3560 = vmatpush3.bf16.msra.mxu1 %v3729_v47 }
 0x25e   : > { %3561 = vmatprep.subr.bf16.mxu1 %v3817_v27 }
 0x261   : > { %3562 = vmatpush3.bf16.msra.mxu1 %v3730_v13 }
 0x262   : > { %3563 = vmatprep.subr.bf16.mxu1 %v3817_v27 }
 0x265   : > { %3564 = vmatpush3.bf16.msra.mxu1 %v3731_v53 }
 0x268   : > { %3566 = vmatmul.mubr.bf16.vlgmr.msra.gmra.mxu1 %v4438_v4 }
 0x269   : > { %3569 = vmatprep.mubr.msk.bf16.mxu1 %vm3818_vm10, %v3817_v27 }
 0x270   : > { %3570 = vmatmul.mubr.bf16.gmra.mxu1 %v4687_v42 }
 0x271   : > { %3573 = vmatprep.mubr.msk.bf16.mxu1 %vm3818_vm10, %v3817_v27 }
 0x275   : > { %v1521_v58 = vpop.f32.mrf.mxu0 }
 0x277   : > { %v3371_v19 = vpop.f32.mrf.mxu0 }
 0x278   : > { %3574 = vmatmul.mubr.bf16.gmra.mxu1 %v3168_v28 }
 0x279   : > { %v1524_v29 = vpop.f32.mrf.mxu0 }
 0x27b   : > { %v3372_v14 = vpop.f32.mrf.mxu0 }
 0x27d   : > { %v1529_v17 = vpop.f32.mrf.mxu0 }
 0x27f   : > { %v3375_v18 = vpop.f32.mrf.mxu0 }
 0x280   : > { %v1410_v50 = vpop.f32.mrf.mxu1 }
 0x281   : > { %v1522_v4 = vadd.f32 %v1521_v58, %v1410_v50  ;;  %v1532_v43 = vpop.f32.mrf.mxu0 }
 0x282   : > { %v3343_v63 = vpop.f32.mrf.mxu1 }
 0x283   : > { %v3376_v49 = vpop.f32.mrf.mxu0 }
 0x284   : > { %v1413_v61 = vpop.f32.mrf.mxu1 }
 0x285   : > { %v1525_v42 = vadd.f32 %v1524_v29, %v1413_v61 }
 0x286   : > { %v3344_v21 = vpop.f32.mrf.mxu1 }
 0x288   : > { %v1418_v57 = vpop.f32.mrf.mxu1 }
 0x289   : > { %v1530_v27 = vadd.f32 %v1529_v17, %v1418_v57 }
 0x28a   : > { %v3347_v1 = vpop.f32.mrf.mxu1 }
 0x28c   : > { %v1421_v11 = vpop.f32.mrf.mxu1 }
 0x28d   : > { %v1533_v22 = vadd.f32 %v1532_v43, %v1421_v11 }
 0x28e   : > { %v3348_v25 = vpop.f32.mrf.mxu1 }
 0x2b5   : > { %v1537_v34 = vpop.f32.mrf.mxu0 }
 0x2b7   : > { %v3379_v62 = vpop.f32.mrf.mxu0 }
 0x2b9   : > { %v1540_v28 = vpop.f32.mrf.mxu0 }
 0x2bb   : > { %v3380_v54 = vpop.f32.mrf.mxu0 }
 0x2bd   : > { %v1784_v55 = vpop.f32.mrf.mxu0 }
 0x2bf   : > { %v3427_v8 = vpop.f32.mrf.mxu0 }
 0x2c0   : > { %v1426_v38 = vpop.f32.mrf.mxu1 }
 0x2c1   : > { %v1538_v36 = vadd.f32 %v1537_v34, %v1426_v38  ;;  %v1787_v37 = vpop.f32.mrf.mxu0 }
 0x2c2   : > { %v3351_v39 = vpop.f32.mrf.mxu1 }
 0x2c3   : > { %v3428_v3 = vpop.f32.mrf.mxu0 }
 0x2c4   : > { %v1429_v5 = vpop.f32.mrf.mxu1 }
 0x2c5   : > { %v1541_v31 = vadd.f32 %v1540_v28, %v1429_v5  ;;  %v1792_v7 = vpop.f32.mrf.mxu0 }
 0x2c6   : > { %v3352_v48 = vpop.f32.mrf.mxu1 }
 0x2c7   : > { %v3431_v20 = vpop.f32.mrf.mxu0 }
 0x2c8   : > { %v1665_v44 = vpop.f32.mrf.mxu1 }
 0x2c9   : > { %v1688_v51 = vadd.f32 %v1665_v44, %v1522_v4  ;;  %v1795_v52 = vpop.f32.mrf.mxu0 }
 0x2ca   : > { %v3399_v0 = vpop.f32.mrf.mxu1 }
 0x2cb   : > { %v3432_v33 = vpop.f32.mrf.mxu0  ;;  %v1807_v2 = vadd.f32 %v1784_v55, %v1688_v51 }
 0x2cc   : > { %v1668_v9 = vpop.f32.mrf.mxu1 }
 0x2cd   : > { %v1689_v40 = vadd.f32 %v1668_v9, %v1525_v42  ;;  %v1800_v10 = vpop.f32.mrf.mxu0 }
 0x2ce   : > { %v3400_v12 = vpop.f32.mrf.mxu1 }
 0x2cf   : > { %v3435_v41 = vpop.f32.mrf.mxu0  ;;  %v1808_v45 = vadd.f32 %v1787_v37, %v1689_v40 }
 0x2d0   : > { %v1673_v56 = vpop.f32.mrf.mxu1 }
 0x2d1   : > { %v1690_v32 = vadd.f32 %v1673_v56, %v1530_v27  ;;  %v1803_v15 = vpop.f32.mrf.mxu0 }
 0x2d2   : > { %v3403_v35 = vpop.f32.mrf.mxu1 }
 0x2d3   : > { %v3436_v60 = vpop.f32.mrf.mxu0  ;;  %v1809_v30 = vadd.f32 %v1792_v7, %v1690_v32 }
 0x2d4   : > { %v1676_v24 = vpop.f32.mrf.mxu1 }
 0x2d5   : > { %v1691_v47 = vadd.f32 %v1676_v24, %v1533_v22 }
 0x2d6   : > { %v3404_v13 = vpop.f32.mrf.mxu1 }
 0x2d7   : > { %v1810_v53 = vadd.f32 %v1795_v52, %v1691_v47 }
 0x2d8   : > { %v1681_v58 = vpop.f32.mrf.mxu1 }
 0x2d9   : > { %v1692_v19 = vadd.f32 %v1681_v58, %v1538_v36 }
 0x2da   : > { %v3407_v29 = vpop.f32.mrf.mxu1 }
 0x2db   : > { %v1811_v14 = vadd.f32 %v1800_v10, %v1692_v19 }
 0x2dc   : > { %v1684_v17 = vpop.f32.mrf.mxu1 }
 0x2dd   : > { %v1693_v18 = vadd.f32 %v1684_v17, %v1541_v31  ;;  %v2041_v50 = vpop.f32.mrf.mxu0 }
 0x2de   : > { %v3408_v4 = vpop.f32.mrf.mxu1 }
 0x2df   : > { %v3483_v43 = vpop.f32.mrf.mxu0  ;;  %v1812_v63 = vadd.f32 %v1803_v15, %v1693_v18 }
 0x2e1   : > { %v2044_v49 = vpop.f32.mrf.mxu0 }
 0x2e3   : > { %v3484_v61 = vpop.f32.mrf.mxu0 }
 0x2e5   : > { %v2049_v42 = vpop.f32.mrf.mxu0 }
 0x2e7   : > { %v3487_v21 = vpop.f32.mrf.mxu0 }
 0x2e8   : > { %v1919_v57 = vpop.f32.mrf.mxu1 }
 0x2e9   : > { %v1942_v27 = vadd.f32 %v1919_v57, %v1807_v2  ;;  %v2052_v1 = vpop.f32.mrf.mxu0 }
 0x2ea   : > { %v3455_v11 = vpop.f32.mrf.mxu1 }
 0x2eb   : > { %v3488_v22 = vpop.f32.mrf.mxu0  ;;  %v2064_v25 = vadd.f32 %v2041_v50, %v1942_v27  ;;  %v3737_v11 = vld [vmem:[%s3929_s25 + $0x20] sm:$0xff] }
 0x2ec   : > { %v1922_v34 = vpop.f32.mrf.mxu1  ;;  %v2479_v22 = vrot.slane %v3737_v11, 1 }
 0x2ed   : > { %v1943_v62 = vadd.f32 %v1922_v34, %v1808_v45  ;;  %v2057_v28 = vpop.f32.mrf.mxu0  ;;  %v3738_v34 = vld [vmem:[%s3929_s25 + $0x28] sm:$0x3] }
 0x2ee   : > { %v3456_v54 = vpop.f32.mrf.mxu1 }
 0x2ef   : > { %v3491_v55 = vpop.f32.mrf.mxu0  ;;  %v2065_v8 = vadd.f32 %v2044_v49, %v1943_v62  ;;  %v2480_v62 = vrot.slane %v3738_v34, 1  ;;  %v4879_v54 = vld [vmem:[%s5100_s5] ss:$0 sm:$0xff] }
 0x2f0   : > { %v1927_v38 = vpop.f32.mrf.mxu1 }
 0x2f1   : > { %v1944_v36 = vadd.f32 %v1927_v38, %v1809_v30  ;;  %v2060_v37 = vpop.f32.mrf.mxu0  ;;  %v4881_v38 = vstv %s3178_s16  ;;  %s5131_s16 = smov 56  }
 0x2f2   : > { %v3459_v39 = vpop.f32.mrf.mxu1  ;;  %vm2516_vm1 = vcmp.ge.s32.totalorder %v4881_v38, 0  ;;  %vm2522_vm10 = vcmp.lt.s32.totalorder %v4881_v38, 8 }
 0x2f3   : > { %v3492_v3 = vpop.f32.mrf.mxu0  ;;  %v2066_v5 = vadd.f32 %v2049_v42, %v1944_v36  ;;  %v2481_v39 = vsel %vm2478_vm0, %v2479_v22, %v2480_v62  ;;  %vm2528_vm9 = vmand %vm2516_vm1, %vm2522_vm10 }
 0x2f4   : > { %v1930_v31 = vpop.f32.mrf.mxu1 }
 0x2f5   : > { %v1945_v7 = vadd.f32 %v1930_v31, %v1810_v53 }
 0x2f6   : > { %v3460_v48 = vpop.f32.mrf.mxu1 }
 0x2f7   : > { %v4863_v20 = vadd.f32 %v2052_v1, %v1945_v7  ;;  %v3739_v7 = vld [vmem:[%s3929_s25 + $0x30] sm:$0xff] }
 0x2f8   : > { %v1935_v44 = vpop.f32.mrf.mxu1  ;;  %v2482_v48 = vrot.slane %v3739_v7, 1 }
 0x2f9   : > { %v1946_v51 = vadd.f32 %v1935_v44, %v1811_v14  ;;  %v2511_v44 = vadd.s32 1, %v4881_v38 }
 0x2fa   : > { %v3463_v52 = vpop.f32.mrf.mxu1 }
 0x2fb   : > { %v2068_v0 = vadd.f32 %v2057_v28, %v1946_v51  ;;  %v3740_v52 = vld [vmem:[%s3929_s25 + $0x38] sm:$0x3]  ;;  %vm2517_vm7 = vcmp.ge.s32.totalorder %v2511_v44, 0  ;;  %vm2523_vm8 = vcmp.lt.s32.totalorder %v2511_v44, 8 }
 0x2fc   : > { %v1938_v33 = vpop.f32.mrf.mxu1  ;;  %vm2529_vm13 = vmand %vm2517_vm7, %vm2523_vm8 }
 0x2fd   : > { %v1947_v2 = vadd.f32 %v1938_v33, %v1812_v63  ;;  %v2287_v9 = vpop.f32.mrf.mxu0 }
 0x2fe   : > { %v3464_v40 = vpop.f32.mrf.mxu1 }
 0x2ff   : > { %v3539_v10 = vpop.f32.mrf.mxu0  ;;  %v2069_v12 = vadd.f32 %v2060_v37, %v1947_v2  ;;  %v3741_v2 = vld [vmem:[%s3929_s25 + $0x40] sm:$0xff]  ;;  %v3742_v40 = vld [vmem:[%s3929_s25 + $0x48] sm:$0x3] }
 0x300   : > { %v2486_v10 = vrot.slane %v3742_v40, 1 }
 0x301   : > { %v2290_v41 = vpop.f32.mrf.mxu0 }
 0x303   : > { %v3540_v45 = vpop.f32.mrf.mxu0 }
 0x305   : > { %v4865_v56 = vpop.f32.mrf.mxu0 }
 0x307   : > { %v3543_v32 = vpop.f32.mrf.mxu0 }
 0x308   : > { %v2156_v15 = vpop.f32.mrf.mxu1 }
 0x309   : > { %v4867_v35 = vpop.f32.mrf.mxu0  ;;  %v2179_v57 = vadd.f32 %v2156_v15, %v2064_v25  ;;  %v4883_v25 = vstv %s3042_s27 }
 0x30a   : > { %v3511_v60 = vpop.f32.mrf.mxu1 }
 0x30b   : > { %v3544_v30 = vpop.f32.mrf.mxu0  ;;  %v2310_v1 = vadd.f32 %v2287_v9, %v2179_v57  ;;  %v2485_v9 = vrot.slane %v3741_v2, 1  ;;  %v2513_v57 = vadd.s32 3, %v4881_v38 }
 0x30c   : > { %v2159_v24 = vpop.f32.mrf.mxu1 }
 0x30d   : > { %v2303_v47 = vpop.f32.mrf.mxu0  ;;  %v2180_v27 = vadd.f32 %v2159_v24, %v2065_v8  ;;  %vm2519_vm2 = vcmp.ge.s32.totalorder %v2513_v57, 0  ;;  %vm2525_vm1 = vcmp.lt.s32.totalorder %v2513_v57, 8 }
 0x30e   : > { %v3512_v13 = vpop.f32.mrf.mxu1 }
 0x30f   : > { %v3547_v53 = vpop.f32.mrf.mxu0  ;;  %v2311_v3 = vadd.f32 %v2290_v41, %v2180_v27 }
 0x310   : > { %v2164_v58 = vpop.f32.mrf.mxu1 }
 0x311   : > { %v2306_v19 = vpop.f32.mrf.mxu0  ;;  %v2181_v36 = vadd.f32 %v2164_v58, %v2066_v5  ;;  %v2487_v58 = vsel %vm2478_vm0, %v2485_v9, %v2486_v10 }
 0x312   : > { %v3515_v29 = vpop.f32.mrf.mxu1 }
 0x313   : > { %v3548_v14 = vpop.f32.mrf.mxu0  ;;  %v2312_v32 = vadd.f32 %v4865_v56, %v2181_v36 }
 0x314   : > { %v2167_v17 = vpop.f32.mrf.mxu1 }
 0x315   : > { %v2182_v15 = vadd.f32 %v2167_v17, %v4863_v20 }
 0x316   : > { %v3516_v18 = vpop.f32.mrf.mxu1 }
 0x317   : > { %v2313_v17 = vadd.f32 %v4867_v35, %v2182_v15 }
 0x318   : > { %v2172_v50 = vpop.f32.mrf.mxu1 }
 0x319   : > { %v2183_v4 = vadd.f32 %v2172_v50, %v2068_v0  ;;  %v2483_v0 = vrot.slane %v3740_v52, 1  ;;  %v3743_v50 = vld [vmem:[%s3929_s25 + $0x50] sm:$0xff] }
 0x31a   : > { %v3519_v43 = vpop.f32.mrf.mxu1 }
 0x31b   : > { %v4869_v63 = vadd.f32 %v2303_v47, %v2183_v4  ;;  %v2484_v47 = vsel %vm2478_vm0, %v2482_v48, %v2483_v0  ;;  %v2488_v4 = vrot.slane %v3743_v50, 1  ;;  %v3744_v43 = vld [vmem:[%s3929_s25 + $0x58] sm:$0x3] }
 0x31c   : > { %v2175_v49 = vpop.f32.mrf.mxu1 }
 0x31d   : > { %v2184_v61 = vadd.f32 %v2175_v49, %v2069_v12  ;;  %v2512_v12 = vadd.s32 2, %v4881_v38  ;;  %v2489_v49 = vrot.slane %v3744_v43, 1 }
 0x31e   : > { %v3520_v42 = vpop.f32.mrf.mxu1 }
 0x31f   : > { %v4871_v21 = vadd.f32 %v2306_v19, %v2184_v61  ;;  %vm2518_vm12 = vcmp.ge.s32.totalorder %v2512_v12, 0  ;;  %vm2524_vm14 = vcmp.lt.s32.totalorder %v2512_v12, 8 }
 0x320   : > { %vm2530_vm6 = vmand %vm2518_vm12, %vm2524_vm14 }
 0x328   : > { %v2405_v28 = vpop.f32.mrf.mxu1 }
 0x329   : > { %v2428_v55 = vadd.f32 %v2405_v28, %v2310_v1 }
 0x32a   : > { %v3567_v8 = vpop.f32.mrf.mxu1 }
 0x32b   : > { %v2441_v37 = vadd.f32 %v4879_v54, %v2428_v55  ;;  %v2490_v8 = vsel %vm2478_vm0, %v2488_v4, %v2489_v49 }
 0x32c   : > { %v2408_v31 = vpop.f32.mrf.mxu1 }
 0x32d   : > { %vm2447_vm15 = vcmp.ge.f32.partialorder %v2441_v37, 0.0  ;;  %v2454_v51 = vmul.f32 %v4883_v25, %v2441_v37  ;;  %v2429_v5 = vadd.f32 %v2408_v31, %v2311_v3 }
 0x32e   : > { %v3568_v33 = vpop.f32.mrf.mxu1 }
 0x32f   : > { %v2460_v41 = vsel %vm2447_vm15, %v2441_v37, %v2454_v51  ;;  %v2442_v45 = vadd.f32 %v4879_v54, %v2429_v5  ;;  %vm2531_vm15 = vmand %vm2519_vm2, %vm2525_vm1  ;;  %vm5134_vm2 = vcmask 130048  }
 0x330   : > { %v2503_v60 = vsub.f32 %v2460_v41, %v2481_v39  ;;  %v2413_v30 = vpop.f32.mrf.mxu1  ;;  %vm5135_vm1 = vmmov %vm5134_vm2 }
 0x331   : > { %vm2448_vm11 = vcmp.ge.f32.partialorder %v2442_v45, 0.0  ;;  %v2455_v24 = vmul.f32 %v4883_v25, %v2442_v45  ;;  %v2430_v13 = vadd.f32 %v2413_v30, %v2312_v32 }
 0x332   : > { %v2546_v53 = vsel %vm2528_vm9, %v2503_v60, 0.0  ;;  %v3571_v19 = vpop.f32.mrf.mxu1 }
 0x333   : > { %v2552_v56 = vpack.c.bf16 %v2546_v53, %v2546_v53  ;;  %v2461_v29 = vsel %vm2448_vm11, %v2442_v45, %v2455_v24  ;;  %v2443_v20 = vadd.f32 %v4879_v54, %v2430_v13  ;;  %v3745_v19 = vld [vmem:[%s3929_s25 + $0x60] sm:$0xff] }
 0x334   : > { %v2504_v14 = vsub.f32 %v2461_v29, %v2484_v47  ;;  %v2416_v18 = vpop.f32.mrf.mxu1  ;;  %v3746_v29 = vld [vmem:[%s3929_s25 + $0x68] sm:$0x3] }
 0x335   : > { %v2559_v61 = vshrl.u32 %v2552_v56, 16  ;;  %vm2449_vm4 = vcmp.ge.f32.partialorder %v2443_v20, 0.0  ;;  %v2456_v42 = vmul.f32 %v4883_v25, %v2443_v20  ;;  %v2431_v1 = vadd.f32 %v2416_v18, %v2313_v17 }
 0x336   : > { %v2547_v27 = vsel %vm2529_vm13, %v2504_v14, 0.0  ;;  %v3572_v11 = vpop.f32.mrf.mxu1  ;;  %v2562_v34 = vshll.u32 %v2552_v56, 16  ;;  %v2491_v56 = vrot.slane %v3745_v19, 1  ;;  %v2514_v17 = vadd.s32 4, %v4881_v38 }
 0x337   : > { %v2561_v22 = vrot.slane %v2559_v61, 7  ;;  %v2553_v62 = vpack.c.bf16 %v2547_v27, %v2547_v27  ;;  %v2462_v28 = vsel %vm2449_vm4, %v2443_v20, %v2456_v42  ;;  %v2444_v55 = vadd.f32 %v4879_v54, %v2431_v1 }
 0x338   : > { %v2505_v35 = vsub.f32 %v2462_v28, %v2487_v58  ;;  %v2421_v36 = vpop.f32.mrf.mxu1  ;;  %v2492_v20 = vrot.slane %v3746_v29, 1  ;;  %vm2520_vm7 = vcmp.ge.s32.totalorder %v2514_v17, 0  ;;  %vm2526_vm8 = vcmp.lt.s32.totalorder %v2514_v17, 8 }
 0x339   : > { %v2564_v37 = vor.u32 %v2562_v34, %v2561_v22  ;;  %v2566_v39 = vshrl.u32 %v2553_v62, 16  ;;  %vm2450_vm10 = vcmp.ge.f32.partialorder %v2444_v55, 0.0  ;;  %v2457_v31 = vmul.f32 %v4883_v25, %v2444_v55  ;;  %vm2532_vm11 = vmand %vm2520_vm7, %vm2526_vm8 }
 0x33a   : > { %v2548_v3 = vsel %vm2530_vm6, %v2505_v35, 0.0  ;;  %v2432_v7 = vadd.f32 %v2421_v36, %v4869_v63  ;;  %v3575_v48 = vpop.f32.mrf.mxu1  ;;  %v2569_v2 = vshll.u32 %v2553_v62, 16  ;;  %v2493_v42 = vsel %vm2478_vm0, %v2491_v56, %v2492_v20  ;;  %v3747_v36 = vld [vmem:[%s3929_s25 + $0x70] sm:$0xff] }
 0x33b   : > { %v2554_v44 = vpack.c.bf16 %v2548_v3, %v2548_v3  ;;  %v2606_v51 = vsel %vm4299_vm5, 0, %v2564_v37  ;;  %v2568_v5 = vrot.slane %v2566_v39, 7  ;;  %v2463_v52 = vsel %vm2450_vm10, %v2444_v55, %v2457_v31  ;;  %v3748_v39 = vld [vmem:[%s3929_s25 + $0x78] sm:$0x3]  ;;  %s5128_s25 = smov 64  }
 0x33c   : > { %v2424_v0 = vpop.f32.mrf.mxu1  ;;  %v4922_v33 = vsel %vm4304_vm3, %v2606_v51, 0  ;;  %v2506_v40 = vsub.f32 %v2463_v52, %v2490_v8  ;;  %v2445_v10 = vadd.f32 %v4879_v54, %v2432_v7  ;;  %v2494_v37 = vrot.slane %v3747_v36, 1 }
 0x33d   : > { %v2573_v9 = vshrl.u32 %v2554_v44, 16  ;;  %v2658_v12 = vrot.slane %v4922_v33, 1  ;;  %v2571_v41 = vor.u32 %v2569_v2, %v2568_v5  ;;  %v2576_v32 = vshll.u32 %v2554_v44, 16 }
 0x33e   : > { %v3576_v63 = vpop.f32.mrf.mxu1  ;;  %v2549_v15 = vsel %vm2531_vm15, %v2506_v40, 0.0  ;;  %v2621_v60 = vshll.u32 %v4922_v33, 16  ;;  %v2458_v58 = vmul.f32 %v4883_v25, %v2445_v10  ;;  %vm2451_vm9 = vcmp.ge.f32.partialorder %v2445_v10, 0.0 }
 0x33f   : > { %v2575_v45 = vrot.slane %v2573_v9, 7  ;;  %2662 = vrot.lane.b32.xlu0 %v2658_v12, %s3810_s10  ;;  %v2607_v30 = vsel %vm4299_vm5, 0, %v2571_v41  ;;  %v2555_v24 = vpack.c.bf16 %v2549_v15, %v2549_v15  ;;  %v2619_v18 = vshrl.u32 %v4922_v33, 16 }
 0x340   : > { %v4932_v47 = vsel %vm4304_vm3, %v2607_v30, 0  ;;  %v2623_v53 = vrot.slane %v2621_v60, 1  ;;  %v2464_v61 = vsel %vm2451_vm9, %v2445_v10, %v2458_v58  ;;  %v2433_v57 = vadd.f32 %v2424_v0, %v4871_v21  ;;  %v3733_v30 = vld [vmem:[%s5101_s6 + $0x18] sm:$0xff]  }
 0x341   : > { %v2578_v13 = vor.u32 %v2576_v32, %v2575_v45  ;;  %v2659_v14 = vrot.slane %v4932_v47, 1  ;;  %v2580_v50 = vshrl.u32 %v2555_v24, 16  ;;  %v2628_v43 = vshll.u32 %v4932_v47, 16  ;;  %v3732_v32 = vld [vmem:[%s5101_s6 + $0x20] ss:$0 sps:$4 sm:$0xff]  }
 0x342   : > { %v2624_v49 = vor.u32 %v2623_v53, %v2619_v18  ;;  %v2626_v22 = vshrl.u32 %v4932_v47, 16  ;;  %v2507_v34 = vsub.f32 %v2464_v61, %v2493_v42  ;;  %v2583_v62 = vshll.u32 %v2555_v24, 16  ;;  %v3736_v61 = vld [vmem:[%s5101_s6] sm:$0xff]  }
 0x343   : > { %2671 = vrot.lane.b32.xlu0 %v4932_v47, %s3809_s26  ;;  %2664 = vrot.lane.b32.xlu1 %v2659_v14, %s3810_s10  ;;  %v2608_v4 = vsel %vm4299_vm5, 0, %v2578_v13  ;;  %v2630_v27 = vrot.slane %v2628_v43, 1  ;;  %v2582_v11 = vrot.slane %v2580_v50, 7  ;;  %v2446_v21 = vadd.f32 %v4879_v54, %v2433_v57 }
 0x344   : > { %v4951_v1 = vsel %vm4304_vm3, %v2608_v4, 0  ;;  %v2550_v55 = vsel %vm2532_vm11, %v2507_v34, 0.0  ;;  %v2495_v3 = vrot.slane %v3748_v39, 1  ;;  %v2515_v7 = vadd.s32 5, %v4881_v38  ;;  %v3735_v4 = vld [vmem:[%s5101_s6 + $0x8] sm:$0xff]  }
 0x345   : > { %v2631_v28 = vor.u32 %v2630_v27, %v2626_v22  ;;  %v2585_v35 = vor.u32 %v2583_v62, %v2582_v11  ;;  %v2459_v8 = vmul.f32 %v4883_v25, %v2446_v21  ;;  %v2660_v31 = vrot.slane %v4951_v1, 1 }
 0x346   : > { %vm2452_vm12 = vcmp.ge.f32.partialorder %v2446_v21, 0.0  ;;  %v2556_v54 = vpack.c.bf16 %v2550_v55, %v2550_v55  ;;  %v2496_v25 = vsel %vm2478_vm0, %v2494_v37, %v2495_v3  ;;  %v2635_v51 = vshll.u32 %v4951_v1, 16 }
 0x347   : > { %2646 = vrot.lane.b32.xlu0 %v2624_v49, %s3811_s13  ;;  %2673 = vrot.lane.b32.xlu1 %v4951_v1, %s3809_s26  ;;  %v2609_v48 = vsel %vm4299_vm5, 0, %v2585_v35  ;;  %v2465_v44 = vsel %vm2452_vm12, %v2446_v21, %v2459_v8  ;;  %vm2521_vm13 = vcmp.ge.s32.totalorder %v2515_v7, 0  ;;  %vm2527_vm14 = vcmp.lt.s32.totalorder %v2515_v7, 8 }
 0x348   : > { %v4974_v38 = vsel %vm4304_vm3, %v2609_v48, 0  ;;  %v2587_v5 = vshrl.u32 %v2556_v54, 16  ;;  %v2508_v52 = vsub.f32 %v2465_v44, %v2496_v25  ;;  %vm2533_vm4 = vmand %vm2521_vm13, %vm2527_vm14  ;;  %v2637_v2 = vrot.slane %v2635_v51, 1 }
 0x349   : > { %v2661_v0 = vrot.slane %v4974_v38, 1  ;;  %v2633_v9 = vshrl.u32 %v4951_v1, 16  ;;  %v2590_v12 = vshll.u32 %v2556_v54, 16  ;;  %v2642_v15 = vshll.u32 %v4974_v38, 16 }
 0x34a   : > { %v2589_v40 = vrot.slane %v2587_v5, 7  ;;  %v2551_v10 = vsel %vm2533_vm4, %v2508_v52, 0.0  ;;  %vm5129_vm0 = vcmask 1043456   ;;  %v2640_v19 = vshrl.u32 %v4974_v38, 16 }
 0x34b   : > { %2695 = vrot.lane.b32.xlu0 %v2659_v14, %s3813_s17  ;;  %2648 = vrot.lane.b32.xlu1 %v2631_v28, %s3811_s13  ;;  %v2638_v63 = vor.u32 %v2637_v2, %v2633_v9  ;;  %v2557_v41 = vpack.c.bf16 %v2551_v10, %v2551_v10  ;;  %vm5130_vm6 = vmmov %vm5129_vm0  ;;  %v2644_v53 = vrot.slane %v2642_v15, 1  ;;  %v3734_v14 = vld [vmem:[%s5101_s6 + $0x10] sm:$0xff]   ;;  %vm5136_vm10 = vcmask 195584  }
 0x34c   : > { %v2592_v45 = vor.u32 %v2590_v12, %v2589_v40  ;;  %3592 = vmatprep.subr.msk.bf16.mxu0 %vm5129_vm0, %v3732_v32  ;;  %v2860_v60 = vsel %vm5130_vm6, %v3732_v32, 0  ;;  %vm5137_vm15 = vcmask 261120   ;;  %vm5138_vm9 = vmmov %vm5136_vm10  ;;  %vm5140_vm8 = vcmask 326656  }
 0x34d   : > { %3578 = vmatpush3.bf16.msra.mxu0 %v2860_v60  ;;  %v2594_v13 = vshrl.u32 %v2557_v41, 16  ;;  %v2645_v29 = vor.u32 %v2644_v53, %v2640_v19  ;;  %v2597_v20 = vshll.u32 %v2557_v41, 16  ;;  %vm5139_vm7 = vmmov %vm5137_vm15  ;;  %vm5142_vm12 = vcmask 392192  }
 0x34e   : > { %v2610_v24 = vsel %vm4299_vm5, 0, %v2592_v45  ;;  %3579 = vmatprep.subr.bf16.mxu0 %v3733_v30  ;;  %vm5141_vm11 = vmmov %vm5140_vm8  ;;  %vm5143_vm13 = vcmask 457728  }
 0x34f   : > { %2704 = vrot.lane.b32.xlu0 %v4951_v1, %s3814_s22  ;;  %2697 = vrot.lane.b32.xlu1 %v2660_v31, %s3813_s17  ;;  %v2616_v58 = vsel %vm4304_vm3, %v2610_v24, 0  ;;  %v2596_v56 = vrot.slane %v2594_v13, 7  ;;  %vm5145_vm4 = vmmov %vm5142_vm12 }
 0x350   : > { %v2694_v18 = vrot.slane %v2616_v58, 1  ;;  %v2682_v43 = vshll.u32 %v2616_v58, 16  ;;  %v2680_v57 = vshrl.u32 %v2616_v58, 16  ;;  %vm5146_vm0 = vmmov %vm5143_vm13 }
 0x351   : > { %3580 = vmatpush3.bf16.msra.mxu0 %v3733_v30  ;;  %v2599_v17 = vor.u32 %v2597_v20, %v2596_v56 }
 0x352   : > { %3581 = vmatprep.subr.bf16.mxu0 %v3734_v14  ;;  %v2684_v23 = vrot.slane %v2682_v43, 1 }
 0x353   : > { %2666 = vrot.lane.b32.xlu0 %v2660_v31, %s3810_s10  ;;  %2706 = vrot.lane.b32.xlu1 %v4974_v38, %s3814_s22  ;;  %v2611_v50 = vsel %vm4299_vm5, 0, %v2599_v17  ;;  %vm5132_vm5 = vcmask 64512  }
 0x354   : > { %v2617_v49 = vsel %vm4304_vm3, %v2611_v50, 0  ;;  %v2685_v27 = vor.u32 %v2684_v23, %v2680_v57  ;;  %vm5133_vm3 = vmmov %vm5132_vm5 }
 0x355   : > { %3582 = vmatpush3.bf16.msra.mxu0 %v3734_v14  ;;  %v2715_v42 = vshll.u32 %v2617_v49, 16  ;;  %v2713_v26 = vshrl.u32 %v2617_v49, 16  ;;  %v2727_v34 = vrot.slane %v2617_v49, 1  ;;  %vm5144_vm14 = vmmov %vm5133_vm3 }
 0x356   : > { %3583 = vmatprep.subr.bf16.mxu0 %v3735_v4  ;;  %vm5147_vm6 = vmmov %vm5133_vm3 }
 0x357   : > { %2686 = vrot.lane.b32.xlu0 %v2631_v28, %s3812_s14  ;;  %2668 = vrot.lane.b32.xlu1 %v2661_v0, %s3810_s10  ;;  %v2717_v11 = vrot.slane %v2715_v42, 1 }
 0x359   : > { %3584 = vmatpush3.bf16.msra.mxu0 %v3735_v4  ;;  %v2718_v22 = vor.u32 %v2717_v11, %v2713_v26 }
 0x35a   : > { %3585 = vmatprep.subr.bf16.mxu0 %v3736_v61 }
 0x35b   : > { %2728 = vrot.lane.b32.xlu0 %v2660_v31, %s5128_s25  ;;  %2688 = vrot.lane.b32.xlu1 %v2638_v63, %s3812_s14 }
 0x35d   : > { %3586 = vmatpush3.bf16.msra.mxu0 %v3736_v61 }
 0x35f   : > { %2675 = vrot.lane.b32.xlu0 %v4974_v38, %s3809_s26  ;;  %2730 = vrot.lane.b32.xlu1 %v2661_v0, %s5128_s25 }
 0x363   : > { %2650 = vrot.lane.b32.xlu0 %v2638_v63, %s3811_s13  ;;  %2677 = vrot.lane.b32.xlu1 %v2616_v58, %s3809_s26 }
 0x367   : > { %2699 = vrot.lane.b32.xlu0 %v2661_v0, %s3813_s17  ;;  %2652 = vrot.lane.b32.xlu1 %v2645_v29, %s3811_s13 }
 0x36b   : > { %2719 = vrot.lane.b32.xlu0 %v2638_v63, %s5131_s16  ;;  %2701 = vrot.lane.b32.xlu1 %v2694_v18, %s3813_s17  ;;  %s3039_s17 = sshll.u32 %s5174_s28, 3 }
 0x36c   : > { %s339_s24 = sadd.s32 %s3039_s17, %s5176_s23 }
 0x36d   : > { %s3040_s18 = sshll.u32 %s339_s24, 3 }
 0x36e   : > { %s341_s15 = scalar_lea.vmem %s5103_s8, %s3040_s18 }
 0x36f   : > { %2708 = vrot.lane.b32.xlu0 %v2616_v58, %s3814_s22  ;;  %2721 = vrot.lane.b32.xlu1 %v2645_v29, %s5131_s16 }
 0x373   : > { %2690 = vrot.lane.b32.xlu0 %v2645_v29, %s3812_s14  ;;  %2710 = vrot.lane.b32.xlu1 %v2617_v49, %s3814_s22 }
 0x377   : > { %2723 = vrot.lane.b32.xlu0 %v2685_v27, %s5131_s16  ;;  %2692 = vrot.lane.b32.xlu1 %v2685_v27, %s3812_s14  ;;  %s3043_s14 = sld [smem:[#allocation2 + $0x2]] }
 0x37b   : > { %2732 = vrot.lane.b32.xlu0 %v2694_v18, %s5128_s25  ;;  %2725 = vrot.lane.b32.xlu1 %v2718_v22, %s5131_s16 }
 0x37f   : > { %2734 = vrot.lane.b32.xlu1 %v2727_v34, %s5128_s25 }
 0x3b1   : > { %v2663_v62 = vpop.permute.xlu0 %2662 }
 0x3b5   : > { %v2672_v21 = vpop.permute.xlu0 %2671  ;;  %v2665_v28 = vpop.permute.xlu1 %2664 }
 0x3b9   : > { %v2647_v35 = vpop.permute.xlu0 %2646  ;;  %v2674_v55 = vpop.permute.xlu1 %2673 }
 0x3ba   : > { %v2737_v5 = vsel %vm5132_vm5, %v4922_v33, %v2647_v35  ;;  %vm5148_vm5 = vcmask 523264  }
 0x3bb   : > { %v2745_v2 = vsel %vm5134_vm2, %v2737_v5, %v2663_v62  ;;  %vm5150_vm2 = vmmov %vm5135_vm1 }
 0x3bc   : > { %v2753_v10 = vsel %vm5136_vm10, %v2745_v2, %v2672_v21  ;;  %vm5151_vm10 = vcmask 588800  }
 0x3bd   : > { %v2696_v8 = vpop.permute.xlu0 %2695  ;;  %v2649_v36 = vpop.permute.xlu1 %2648 }
 0x3be   : > { %v2739_v52 = vsel %vm5133_vm3, %v4932_v47, %v2649_v36  ;;  %vm5149_vm3 = vmmov %vm5148_vm5  ;;  %v3179_v36 = vld [vmem:[%s5102_s7] ss:$0 sm:$0xff] }
 0x3bf   : > { %v2747_v40 = vsel %vm5135_vm1, %v2739_v52, %v2665_v28 }
 0x3c0   : > { %v2755_v45 = vsel %vm5138_vm9, %v2747_v40, %v2674_v55 }
 0x3c1   : > { %v2705_v37 = vpop.permute.xlu0 %2704  ;;  %v2698_v39 = vpop.permute.xlu1 %2697 }
 0x3c5   : > { %v2667_v3 = vpop.permute.xlu0 %2666  ;;  %v2707_v31 = vpop.permute.xlu1 %2706 }
 0x3c9   : > { %v2687_v7 = vpop.permute.xlu0 %2686  ;;  %v2669_v54 = vpop.permute.xlu1 %2668 }
 0x3ca   : > { %v2761_v12 = vsel %vm5137_vm15, %v2753_v10, %v2687_v7  ;;  %vm5152_vm15 = vmmov %vm5138_vm9 }
 0x3cb   : > { %v2769_v33 = vsel %vm5140_vm8, %v2761_v12, %v2696_v8  ;;  %vm5153_vm9 = vmmov %vm5139_vm7 }
 0x3cc   : > { %v2777_v30 = vsel %vm5142_vm12, %v2769_v33, %v2705_v37  ;;  %vm5155_vm8 = vmmov %vm5153_vm9 }
 0x3cd   : > { %v2729_v48 = vpop.permute.xlu0 %2728  ;;  %v2689_v44 = vpop.permute.xlu1 %2688  ;;  %vm5156_vm12 = vmmov %vm5141_vm11 }
 0x3ce   : > { %v2763_v32 = vsel %vm5139_vm7, %v2755_v45, %v2689_v44  ;;  %vm5154_vm7 = vmmov %vm5152_vm15 }
 0x3cf   : > { %v2771_v60 = vsel %vm5141_vm11, %v2763_v32, %v2698_v39  ;;  %v2915_v39 = vstv %s3043_s14 }
 0x3d0   : > { %v2779_v58 = vsel %vm5145_vm4, %v2771_v60, %v2707_v31 }
 0x3d1   : > { %v2676_v25 = vpop.permute.xlu0 %2675  ;;  %v2731_v51 = vpop.permute.xlu1 %2730 }
 0x3d5   : > { %v2651_v0 = vpop.permute.xlu0 %2650  ;;  %v2678_v9 = vpop.permute.xlu1 %2677 }
 0x3d6   : > { %v2741_v53 = vsel %vm5144_vm14, %v4951_v1, %v2651_v0  ;;  %vm5158_vm14 = vmmov %vm5145_vm4 }
 0x3d7   : > { %v2749_v17 = vsel %vm5150_vm2, %v2741_v53, %v2667_v3 }
 0x3d8   : > { %v2757_v1 = vsel %vm5152_vm15, %v2749_v17, %v2676_v25 }
 0x3d9   : > { %v2700_v63 = vpop.permute.xlu0 %2699  ;;  %v2653_v41 = vpop.permute.xlu1 %2652 }
 0x3da   : > { %v2743_v29 = vsel %vm5147_vm6, %v4974_v38, %v2653_v41  ;;  %vm5160_vm6 = vmmov %vm5149_vm3 }
 0x3db   : > { %v2751_v43 = vsel %vm5135_vm1, %v2743_v29, %v2669_v54 }
 0x3dc   : > { %v2759_v38 = vsel %vm5154_vm7, %v2751_v43, %v2678_v9 }
 0x3dd   : > { %v2720_v15 = vpop.permute.xlu0 %2719  ;;  %v2702_v47 = vpop.permute.xlu1 %2701 }
 0x3de   : > { %v2785_v24 = vsel %vm5143_vm13, %v2777_v30, %v2720_v15  ;;  %vm5157_vm13 = vmmov %vm5145_vm4 }
 0x3df   : > { %v2793_v20 = vsel %vm5148_vm5, %v2785_v24, %v2729_v48  ;;  %vm5159_vm4 = vmmov %vm5146_vm0 }
 0x3e0   : > { %vm5161_vm5 = vmmov %vm5149_vm3 }
 0x3e1   : > { %v2709_v13 = vpop.permute.xlu0 %2708  ;;  %v2722_v19 = vpop.permute.xlu1 %2721 }
 0x3e2   : > { %v2787_v56 = vsel %vm5146_vm0, %v2779_v58, %v2722_v19 }
 0x3e3   : > { %v2795_v14 = vsel %vm5149_vm3, %v2787_v56, %v2731_v51  ;;  %vm5162_vm3 = vmmov %vm5151_vm10 }
 0x3e4   : > { %v3180_v18 = vcombine.low %v2793_v20, %v2795_v14 }
 0x3e5   : > { %v2691_v50 = vpop.permute.xlu0 %2690  ;;  %v2711_v4 = vpop.permute.xlu1 %2710 }
 0x3e6   : > { %3587 = vmatprep.mubr.msk.bf16.mxu0 %vm5151_vm10, %v3180_v18  ;;  %v2765_v49 = vsel %vm5153_vm9, %v2757_v1, %v2691_v50 }
 0x3e7   : > { %v2773_v57 = vsel %vm5141_vm11, %v2765_v49, %v2700_v63 }
 0x3e8   : > { %v2781_v26 = vsel %vm5157_vm13, %v2773_v57, %v2709_v13 }
 0x3e9   : > { %v2724_v61 = vpop.permute.xlu0 %2723  ;;  %v2693_v23 = vpop.permute.xlu1 %2692 }
 0x3ea   : > { %v2767_v42 = vsel %vm5155_vm8, %v2759_v38, %v2693_v23  ;;  %v2789_v62 = vsel %vm5159_vm4, %v2781_v26, %v2724_v61 }
 0x3eb   : > { %v2775_v27 = vsel %vm5156_vm12, %v2767_v42, %v2702_v47 }
 0x3ec   : > { %v2783_v22 = vsel %vm5158_vm14, %v2775_v27, %v2711_v4 }
 0x3ed   : > { %v2726_v11 = vpop.permute.xlu1 %2725  ;;  %v2733_v34 = vpop.permute.xlu0 %2732 }
 0x3ee   : > { %v2791_v21 = vsel %vm5146_vm0, %v2783_v22, %v2726_v11  ;;  %v2797_v35 = vsel %vm5160_vm6, %v2789_v62, %v2733_v34 }
 0x3f1   : > { %v2735_v28 = vpop.permute.xlu1 %2734 }
 0x3f2   : > { %v2799_v55 = vsel %vm5161_vm5, %v2791_v21, %v2735_v28 }
 0x3f3   : > { %v3181_v8 = vcombine.low %v2797_v35, %v2799_v55 }
 0x3f5   : > { %3588 = vmatmul.mubr.msk.bf16.vlgmr.msra.gmra.mxu0 %vm5162_vm3, %v3181_v8 }
 0x4b5   : > { %v3589_v37 = vpop.f32.mrf.mxu0 }
 0x4b6   : > { %v2905_v3 = vadd.f32 %v3589_v37, %v3179_v36 }
 0x4b7   : > { %v2896_v31 = vpop.f32.mrf.mxu0 }
 0x4b8   : > { %vm2913_vm2 = vcmp.ge.f32.partialorder %v2905_v3, 0.0  ;;  %v2918_v7 = vmul.f32 %v2915_v39, %v2905_v3  ;;  %v2897_v54 = vadd.f32 %v3179_v36, %v2896_v31 }
 0x4b9   : > { %v3590_v48 = vpop.f32.mrf.mxu0 }
 0x4ba   : > { %v2922_v44 = vsel %vm2913_vm2, %v2905_v3, %v2918_v7  ;;  %vm2911_vm1 = vcmp.ge.f32.partialorder %v2897_v54, 0.0  ;;  %v2916_v25 = vmul.f32 %v2915_v39, %v2897_v54  ;;  %v2908_v51 = vadd.f32 %v3590_v48, %v3179_v36 }
 0x4bb   : > { %v2926_v5 = vadd.f32 %v2922_v44, %v4510_v46  ;;  %v2899_v52 = vpop.f32.mrf.mxu0 }
 0x4bc   : > { %v2920_v0 = vsel %vm2911_vm1, %v2897_v54, %v2916_v25  ;;  %vm2914_vm10 = vcmp.ge.f32.partialorder %v2908_v51, 0.0  ;;  %v2919_v2 = vmul.f32 %v2915_v39, %v2908_v51  ;;  %v2900_v9 = vadd.f32 %v3179_v36, %v2899_v52 }
 0x4bd   : > { %2930 = vst [vmem:[%s341_s15 + $0x10] sm:$0xff] %v2926_v5  ;;  %v2924_v40 = vadd.f32 %v2920_v0, %v4283_v6 }
 0x4be   : > { %v2923_v10 = vsel %vm2914_vm10, %v2908_v51, %v2919_v2  ;;  %vm2912_vm15 = vcmp.ge.f32.partialorder %v2900_v9, 0.0  ;;  %v2917_v63 = vmul.f32 %v2915_v39, %v2900_v9 }
 0x4bf   : > { %2928 = vst [vmem:[%s341_s15] sm:$0xff] %v2924_v40  ;;  %v2927_v12 = vadd.f32 %v2923_v10, %v4516_v59 }
 0x4c0   : > { %v2921_v41 = vsel %vm2912_vm15, %v2900_v9, %v2917_v63 }
 0x4c1   : > { %2931 = vst [vmem:[%s341_s15 + $0x18] sm:$0xff] %v2927_v12  ;;  %v2925_v45 = vadd.f32 %v2921_v41, %v4290_v16 }
 0x4c3   : > { %2929 = vst [vmem:[%s341_s15 + $0x8] sm:$0xff] %v2925_v45 }
 0x4c4 PF: > { %s19_s9 = sadd.s32 1, %s3806_s9   ;;  %s5163_s27 = smov %s3798_s29 }
 0x4c5   : > { %p16_p4 = scmp.ge.s32.totalorder %s19_s9, 6   ;;  %s5164_s28 = smov %s3802_s30 }
 0x4c6   : > { %s5165_s29 = smov %s5168_s11  ;;  %s5166_s30 = smov %s5172_s12 }
 0x4c7   :  { %18 = sbr.rel (!%p16_p4) target bundleno = 3 (0x3), region = 88 }
 0x4cc   :  { %2962 = vsyncpa [#allocation3], 1 }
 0x4cd   :  { %2964 = vsyncpa [#allocation3 + $0x1], 1 }

</bundles_post_ra>
